<compile_context>
chip_gen: v6e
topology: v6e:2x2x1
jax: 0.10.0
libtpu: 0.0.40
codegen_flags: <defaults>
</compile_context>

<pallas_src>
import functools

import jax
import jax.numpy as jnp
from jax.experimental import pallas as pl
from jax.experimental.pallas import tpu as pltpu


LATENT_DIM = 32
IMG_SHAPE = (1, 8, 8)          # (C, H, W) -- small synthetic image
IMG_FLAT = 1 * 8 * 8           # 64
OUT_PAD = 128                  # lane-dense padded width for the final layer
HIDDEN = (128, 256, 512, 1024)
BN_EPS = 0.8
LEAKY_SLOPE = 0.2

# Packed small-parameter layout: one (1, VEC_TOTAL) f32 row.  Every offset is
# a multiple of 128 so in-kernel static slices stay lane-aligned.
_OFF_B1 = 0          # (128,)  bias of Linear(latent, 128)
_OFF_G2 = 128        # (256,)  BN2 gamma
_OFF_BE2 = 384       # (256,)  BN2 beta
_OFF_G3 = 640        # (512,)  BN3 gamma
_OFF_BE3 = 1152      # (512,)  BN3 beta
_OFF_G4 = 1664       # (1024,) BN4 gamma
_OFF_BE4 = 2688      # (1024,) BN4 beta
_OFF_B5 = 3712       # (128,)  bias of final Linear (zero-padded 64 -> 128)
VEC_TOTAL = 3840


def _leaky_relu(x):
    return jnp.where(x > 0, x, LEAKY_SLOPE * x)


def generator_kernel(z_ref, w1_ref, w2_ref, w3_ref, w4_ref, w5_ref, vec_ref,
                     out_ref):
    # Static, lane-aligned slices of the single packed small-parameter row.
    b1 = vec_ref[:, _OFF_B1:_OFF_B1 + 128]
    g2 = vec_ref[:, _OFF_G2:_OFF_G2 + 256]
    be2 = vec_ref[:, _OFF_BE2:_OFF_BE2 + 256]
    g3 = vec_ref[:, _OFF_G3:_OFF_G3 + 512]
    be3 = vec_ref[:, _OFF_BE3:_OFF_BE3 + 512]
    g4 = vec_ref[:, _OFF_G4:_OFF_G4 + 1024]
    be4 = vec_ref[:, _OFF_BE4:_OFF_BE4 + 1024]
    b5 = vec_ref[:, _OFF_B5:_OFF_B5 + 128]

    # block(latent_dim, 128, normalize=False)
    z = z_ref[...].astype(jnp.bfloat16)
    h = jnp.dot(z, w1_ref[...], preferred_element_type=jnp.float32) + b1
    h = _leaky_relu(h)

    # block(in, out) with training-mode BatchNorm1d(out, eps=0.8).
    #  - The Linear bias before a training-mode BN is exactly cancelled by the
    #    batch-mean subtraction, so b2/b3/b4 are not computed (no DMA, no add).
    #  - BN affine is fused into (1, N) scalars: h_norm = h*s + t.
    #  - One-pass variance E[x^2]-mean^2 is safe because eps=0.8 dominates.
    for w_ref, g, be in ((w2_ref, g2, be2), (w3_ref, g3, be3), (w4_ref, g4, be4)):
        h = jnp.dot(h.astype(jnp.bfloat16), w_ref[...],
                    preferred_element_type=jnp.float32)
        mean = jnp.mean(h, axis=0, keepdims=True)
        mean_sq = jnp.mean(h * h, axis=0, keepdims=True)
        var = mean_sq - mean * mean
        s = g * jax.lax.rsqrt(var + BN_EPS)
        t = be - mean * s
        h = _leaky_relu(h * s + t)

    # Linear(1024, prod(img_shape)) -> Tanh   (lane-padded to 128 columns)
    h = jnp.dot(h.astype(jnp.bfloat16), w5_ref[...],
                preferred_element_type=jnp.float32) + b5
    out_ref[...] = jnp.tanh(h)


def init_params(key):
    """Deterministic parameter init (PyTorch-like uniform fan-in bounds).

    Weights are (in_features, out_features) in bfloat16; small vectors stay
    float32.  The final layer is zero-padded 64 -> 128 output columns so the
    kernel's last matmul + store are lane-dense (b5 padding must stay 0 so
    tanh(0)=0 in the padded lanes sliced away by the wrapper).  b2/b3/b4 are
    generated only for the pure-JAX reference -- the kernel never sees them
    because training-mode BatchNorm cancels them exactly.
    """
    dims = (LATENT_DIM,) + HIDDEN + (IMG_FLAT,)
    params = {}
    for i in range(5):
        fan_in, fan_out = dims[i], dims[i + 1]
        key, kw, kb = jax.random.split(key, 3)
        bound = float(fan_in) ** -0.5
        w = jax.random.uniform(kw, (fan_in, fan_out), jnp.float32, -bound, bound)
        b = jax.random.uniform(kb, (1, fan_out), jnp.float32, -bound, bound)
        if i == 4:  # lane-pad the 64-wide final layer to 128 with zeros
            w = jnp.pad(w, ((0, 0), (0, OUT_PAD - IMG_FLAT)))
            b = jnp.pad(b, ((0, 0), (0, OUT_PAD - IMG_FLAT)))
        params[f"w{i+1}"] = w.astype(jnp.bfloat16)
        params[f"b{i+1}"] = b
    # BatchNorm affine params (PyTorch init: weight=1, bias=0) for layers 2..4
    for i, d in zip((2, 3, 4), HIDDEN[1:]):
        params[f"g{i}"] = jnp.ones((1, d), jnp.float32)
        params[f"be{i}"] = jnp.zeros((1, d), jnp.float32)
    # Single packed row consumed by the kernel (layout matches _OFF_* above).
    params["vec"] = jnp.concatenate(
        [params["b1"], params["g2"], params["be2"], params["g3"], params["be3"],
         params["g4"], params["be4"], params["b5"]], axis=1)
    assert params["vec"].shape == (1, VEC_TOTAL)
    return params


@functools.partial(jax.jit, static_argnames=("group_size",))
def generator_forward(z, params, group_size=None):
    """Generator forward.

    group_size=None: the whole batch is one BatchNorm group (exact PyTorch
    training-mode semantics, grid of 1).
    group_size=G (multiple of 8): rows are independent batches of G stacked on
    axis 0; the grid iterates over groups with all weights resident in VMEM
    (index_map -> block (0,0) every step) and the axis marked 'parallel' so
    both v7x TensorCores share the groups.
    """
    B = z.shape[0]
    g = B if group_size is None else group_size
    assert B % g == 0 and (g == B or g % 8 == 0)

    weight_args = (params["w1"], params["w2"], params["w3"], params["w4"],
                   params["w5"])
    resident = lambda i: (0, 0)           # same block every grid step
    w_specs = [pl.BlockSpec(w.shape, resident) for w in weight_args]

    flat = pl.pallas_call(
        generator_kernel,
        out_shape=jax.ShapeDtypeStruct((B, OUT_PAD), jnp.float32),
        grid=(B // g,),
        in_specs=[pl.BlockSpec((g, LATENT_DIM), lambda i: (i, 0))]
                 + w_specs
                 + [pl.BlockSpec((1, VEC_TOTAL), resident)],
        out_specs=pl.BlockSpec((g, OUT_PAD), lambda i: (i, 0)),
        compiler_params=pltpu.CompilerParams(
            dimension_semantics=("parallel",),
            vmem_limit_bytes=16 << 20),
    )(z, *weight_args, params["vec"])
    # Drop the zero-padded lanes, then img.view(B, *img_shape) (NCHW).
    return flat[:, :IMG_FLAT].reshape(B, *IMG_SHAPE)


def _reference_forward(z, params, group_size=None):
    """Pure-JAX reference with the FULL per-layer biases and two-pass
    training-mode BatchNorm (i.e. the original module's math, with bf16
    matmuls / f32 accumulation).  Validates that dropping b2-b4 and fusing the
    BN affine in the kernel is exact up to rounding."""
    B = z.shape[0]
    g = B if group_size is None else group_size

    def one_group(zg):
        h = jnp.dot(zg.astype(jnp.bfloat16), params["w1"],
                    preferred_element_type=jnp.float32) + params["b1"]
        h = jnp.where(h > 0, h, LEAKY_SLOPE * h)
        for i in (2, 3, 4):
            h = jnp.dot(h.astype(jnp.bfloat16), params[f"w{i}"],
                        preferred_element_type=jnp.float32) + params[f"b{i}"]
            m = h.mean(axis=0, keepdims=True)
            v = ((h - m) ** 2).mean(axis=0, keepdims=True)
            h = (h - m) * jax.lax.rsqrt(v + BN_EPS) * params[f"g{i}"] \
                + params[f"be{i}"]
            h = jnp.where(h > 0, h, LEAKY_SLOPE * h)
        h = jnp.dot(h.astype(jnp.bfloat16), params["w5"],
                    preferred_element_type=jnp.float32) + params["b5"]
        return jnp.tanh(h)[:, :IMG_FLAT]

    out = jnp.concatenate([one_group(z[s:s + g]) for s in range(0, B, g)],
                          axis=0)
    return out.reshape(B, *IMG_SHAPE)


if __name__ == "__main__":
    key = jax.random.PRNGKey(0)
    key, zk, zk2 = jax.random.split(key, 3)
    params = init_params(key)

    # (1) Single batch of 8: exact PyTorch training-mode BatchNorm semantics.
    B = 8
    z = jax.random.normal(zk, (B, LATENT_DIM), jnp.float32)
    img = generator_forward(z, params)
    jax.block_until_ready(img)
    ref = _reference_forward(z, params)
    assert img.shape == (B, *IMG_SHAPE), img.shape
    err = float(jnp.max(jnp.abs(img - ref)))
    assert jnp.allclose(img, ref, atol=2e-2, rtol=2e-2), err

    # (2) Four independent batches of 8 stacked on axis 0: batch-group grid
    #     with resident weights; 'parallel' axis engages both v7x TCs.
    z4 = jax.random.normal(zk2, (4 * B, LATENT_DIM), jnp.float32)
    img4 = generator_forward(z4, params, group_size=B)
    jax.block_until_ready(img4)
    ref4 = _reference_forward(z4, params, group_size=B)
    assert img4.shape == (4 * B, *IMG_SHAPE), img4.shape
    err4 = float(jnp.max(jnp.abs(img4 - ref4)))
    assert jnp.allclose(img4, ref4, atol=2e-2, rtol=2e-2), err4

    print("KERNEL_OK")
</pallas_src>

<mosaic_0001>
module attributes {stable_mosaic.version = 11 : i64} {
  func.func @generator_kernel(%arg0: i32, %arg1: memref<8x32xf32, #tpu.memory_space<vmem>>, %arg2: memref<32x128xbf16, #tpu.memory_space<vmem>>, %arg3: memref<128x256xbf16, #tpu.memory_space<vmem>>, %arg4: memref<256x512xbf16, #tpu.memory_space<vmem>>, %arg5: memref<512x1024xbf16, #tpu.memory_space<vmem>>, %arg6: memref<1024x128xbf16, #tpu.memory_space<vmem>>, %arg7: memref<1x3840xf32, #tpu.memory_space<vmem>>, %arg8: memref<8x128xf32, #tpu.memory_space<vmem>>) attributes {dimension_semantics = [#tpu.dimension_semantics<parallel>], iteration_bounds = array<i64: 1>, scalar_prefetch = 0 : i64, scratch_operands = 0 : i64, tpu.core_type = #tpu.core_type<tc>, window_params = [{transform_indices = @transform_0, window_bounds = array<i64: 8, 32>}, {pipeline_mode = #tpu.pipeline_mode<synchronous>, transform_indices = @transform_1, window_bounds = array<i64: 32, 128>}, {pipeline_mode = #tpu.pipeline_mode<synchronous>, transform_indices = @transform_2, window_bounds = array<i64: 128, 256>}, {pipeline_mode = #tpu.pipeline_mode<synchronous>, transform_indices = @transform_3, window_bounds = array<i64: 256, 512>}, {pipeline_mode = #tpu.pipeline_mode<synchronous>, transform_indices = @transform_4, window_bounds = array<i64: 512, 1024>}, {pipeline_mode = #tpu.pipeline_mode<synchronous>, transform_indices = @transform_5, window_bounds = array<i64: 1024, 128>}, {pipeline_mode = #tpu.pipeline_mode<synchronous>, transform_indices = @transform_6, window_bounds = array<i64: 1, 3840>}, {transform_indices = @transform_7, window_bounds = array<i64: 8, 128>}]} {
    %c0 = arith.constant 0 : index
    %c0_0 = arith.constant 0 : index
    %0 = vector.load %arg7[%c0, %c0_0] : memref<1x3840xf32, #tpu.memory_space<vmem>>, vector<1x128xf32>
    %c0_1 = arith.constant 0 : index
    %c128 = arith.constant 128 : index
    %1 = vector.load %arg7[%c0_1, %c128] : memref<1x3840xf32, #tpu.memory_space<vmem>>, vector<1x256xf32>
    %c0_2 = arith.constant 0 : index
    %c384 = arith.constant 384 : index
    %2 = vector.load %arg7[%c0_2, %c384] : memref<1x3840xf32, #tpu.memory_space<vmem>>, vector<1x256xf32>
    %c0_3 = arith.constant 0 : index
    %c640 = arith.constant 640 : index
    %3 = vector.load %arg7[%c0_3, %c640] : memref<1x3840xf32, #tpu.memory_space<vmem>>, vector<1x512xf32>
    %c0_4 = arith.constant 0 : index
    %c1152 = arith.constant 1152 : index
    %4 = vector.load %arg7[%c0_4, %c1152] : memref<1x3840xf32, #tpu.memory_space<vmem>>, vector<1x512xf32>
    %c0_5 = arith.constant 0 : index
    %c1664 = arith.constant 1664 : index
    %5 = vector.load %arg7[%c0_5, %c1664] : memref<1x3840xf32, #tpu.memory_space<vmem>>, vector<1x1024xf32>
    %c0_6 = arith.constant 0 : index
    %c2688 = arith.constant 2688 : index
    %6 = vector.load %arg7[%c0_6, %c2688] : memref<1x3840xf32, #tpu.memory_space<vmem>>, vector<1x1024xf32>
    %c0_7 = arith.constant 0 : index
    %c3712 = arith.constant 3712 : index
    %7 = vector.load %arg7[%c0_7, %c3712] : memref<1x3840xf32, #tpu.memory_space<vmem>>, vector<1x128xf32>
    %c0_8 = arith.constant 0 : index
    %c0_9 = arith.constant 0 : index
    %8 = vector.load %arg1[%c0_8, %c0_9] : memref<8x32xf32, #tpu.memory_space<vmem>>, vector<8x32xf32>
    %9 = arith.truncf %8 : vector<8x32xf32> to vector<8x32xbf16>
    %c0_10 = arith.constant 0 : index
    %c0_11 = arith.constant 0 : index
    %10 = vector.load %arg2[%c0_10, %c0_11] : memref<32x128xbf16, #tpu.memory_space<vmem>>, vector<32x128xbf16>
    %cst = arith.constant dense<0.000000e+00> : vector<8x128xf32>
    %11 = tpu.matmul %9, %10, %cst {dimension_numbers = #tpu.dot_dimension_numbers<[1], [0], [0], [1], [0, 0, 1, 1], [], []>} : vector<8x32xbf16>, vector<32x128xbf16>, vector<8x128xf32> -> vector<8x128xf32>
    %12 = vector.broadcast %0 : vector<1x128xf32> to vector<8x128xf32>
    %13 = arith.addf %11, %12 : vector<8x128xf32>
    %cst_12 = arith.constant 0.000000e+00 : f32
    %14 = vector.broadcast %cst_12 : f32 to vector<8x128xf32>
    %15 = arith.cmpf ogt, %13, %14 : vector<8x128xf32>
    %cst_13 = arith.constant 2.000000e-01 : f32
    %16 = vector.broadcast %cst_13 : f32 to vector<8x128xf32>
    %17 = arith.mulf %16, %13 : vector<8x128xf32>
    %18 = arith.select %15, %13, %17 : vector<8x128xi1>, vector<8x128xf32>
    %19 = arith.truncf %18 : vector<8x128xf32> to vector<8x128xbf16>
    %c0_14 = arith.constant 0 : index
    %c0_15 = arith.constant 0 : index
    %20 = vector.load %arg3[%c0_14, %c0_15] : memref<128x256xbf16, #tpu.memory_space<vmem>>, vector<128x256xbf16>
    %cst_16 = arith.constant dense<0.000000e+00> : vector<8x256xf32>
    %21 = tpu.matmul %19, %20, %cst_16 {dimension_numbers = #tpu.dot_dimension_numbers<[1], [0], [0], [1], [0, 0, 1, 1], [], []>} : vector<8x128xbf16>, vector<128x256xbf16>, vector<8x256xf32> -> vector<8x256xf32>
    %cst_17 = arith.constant dense<0.000000e+00> : vector<256xf32>
    %22 = vector.multi_reduction <add>, %21, %cst_17 [0] : vector<8x256xf32> to vector<256xf32>
    %23 = vector.shape_cast %22 : vector<256xf32> to vector<1x256xf32>
    %cst_18 = arith.constant 8.000000e+00 : f32
    %24 = vector.broadcast %cst_18 : f32 to vector<1x256xf32>
    %25 = arith.divf %23, %24 : vector<1x256xf32>
    %26 = arith.mulf %21, %21 : vector<8x256xf32>
    %cst_19 = arith.constant dense<0.000000e+00> : vector<256xf32>
    %27 = vector.multi_reduction <add>, %26, %cst_19 [0] : vector<8x256xf32> to vector<256xf32>
    %28 = vector.shape_cast %27 : vector<256xf32> to vector<1x256xf32>
    %cst_20 = arith.constant 8.000000e+00 : f32
    %29 = vector.broadcast %cst_20 : f32 to vector<1x256xf32>
    %30 = arith.divf %28, %29 : vector<1x256xf32>
    %31 = arith.mulf %25, %25 : vector<1x256xf32>
    %32 = arith.subf %30, %31 : vector<1x256xf32>
    %cst_21 = arith.constant 8.000000e-01 : f32
    %33 = vector.broadcast %cst_21 : f32 to vector<1x256xf32>
    %34 = arith.addf %32, %33 : vector<1x256xf32>
    %35 = math.rsqrt %34 : vector<1x256xf32>
    %36 = arith.mulf %1, %35 : vector<1x256xf32>
    %37 = arith.mulf %25, %36 : vector<1x256xf32>
    %38 = arith.subf %2, %37 : vector<1x256xf32>
    %39 = vector.broadcast %36 : vector<1x256xf32> to vector<8x256xf32>
    %40 = arith.mulf %21, %39 : vector<8x256xf32>
    %41 = vector.broadcast %38 : vector<1x256xf32> to vector<8x256xf32>
    %42 = arith.addf %40, %41 : vector<8x256xf32>
    %cst_22 = arith.constant 0.000000e+00 : f32
    %43 = vector.broadcast %cst_22 : f32 to vector<8x256xf32>
    %44 = arith.cmpf ogt, %42, %43 : vector<8x256xf32>
    %cst_23 = arith.constant 2.000000e-01 : f32
    %45 = vector.broadcast %cst_23 : f32 to vector<8x256xf32>
    %46 = arith.mulf %45, %42 : vector<8x256xf32>
    %47 = arith.select %44, %42, %46 : vector<8x256xi1>, vector<8x256xf32>
    %48 = arith.truncf %47 : vector<8x256xf32> to vector<8x256xbf16>
    %c0_24 = arith.constant 0 : index
    %c0_25 = arith.constant 0 : index
    %49 = vector.load %arg4[%c0_24, %c0_25] : memref<256x512xbf16, #tpu.memory_space<vmem>>, vector<256x512xbf16>
    %cst_26 = arith.constant dense<0.000000e+00> : vector<8x512xf32>
    %50 = tpu.matmul %48, %49, %cst_26 {dimension_numbers = #tpu.dot_dimension_numbers<[1], [0], [0], [1], [0, 0, 1, 1], [], []>} : vector<8x256xbf16>, vector<256x512xbf16>, vector<8x512xf32> -> vector<8x512xf32>
    %cst_27 = arith.constant dense<0.000000e+00> : vector<512xf32>
    %51 = vector.multi_reduction <add>, %50, %cst_27 [0] : vector<8x512xf32> to vector<512xf32>
    %52 = vector.shape_cast %51 : vector<512xf32> to vector<1x512xf32>
    %cst_28 = arith.constant 8.000000e+00 : f32
    %53 = vector.broadcast %cst_28 : f32 to vector<1x512xf32>
    %54 = arith.divf %52, %53 : vector<1x512xf32>
    %55 = arith.mulf %50, %50 : vector<8x512xf32>
    %cst_29 = arith.constant dense<0.000000e+00> : vector<512xf32>
    %56 = vector.multi_reduction <add>, %55, %cst_29 [0] : vector<8x512xf32> to vector<512xf32>
    %57 = vector.shape_cast %56 : vector<512xf32> to vector<1x512xf32>
    %cst_30 = arith.constant 8.000000e+00 : f32
    %58 = vector.broadcast %cst_30 : f32 to vector<1x512xf32>
    %59 = arith.divf %57, %58 : vector<1x512xf32>
    %60 = arith.mulf %54, %54 : vector<1x512xf32>
    %61 = arith.subf %59, %60 : vector<1x512xf32>
    %cst_31 = arith.constant 8.000000e-01 : f32
    %62 = vector.broadcast %cst_31 : f32 to vector<1x512xf32>
    %63 = arith.addf %61, %62 : vector<1x512xf32>
    %64 = math.rsqrt %63 : vector<1x512xf32>
    %65 = arith.mulf %3, %64 : vector<1x512xf32>
    %66 = arith.mulf %54, %65 : vector<1x512xf32>
    %67 = arith.subf %4, %66 : vector<1x512xf32>
    %68 = vector.broadcast %65 : vector<1x512xf32> to vector<8x512xf32>
    %69 = arith.mulf %50, %68 : vector<8x512xf32>
    %70 = vector.broadcast %67 : vector<1x512xf32> to vector<8x512xf32>
    %71 = arith.addf %69, %70 : vector<8x512xf32>
    %cst_32 = arith.constant 0.000000e+00 : f32
    %72 = vector.broadcast %cst_32 : f32 to vector<8x512xf32>
    %73 = arith.cmpf ogt, %71, %72 : vector<8x512xf32>
    %cst_33 = arith.constant 2.000000e-01 : f32
    %74 = vector.broadcast %cst_33 : f32 to vector<8x512xf32>
    %75 = arith.mulf %74, %71 : vector<8x512xf32>
    %76 = arith.select %73, %71, %75 : vector<8x512xi1>, vector<8x512xf32>
    %77 = arith.truncf %76 : vector<8x512xf32> to vector<8x512xbf16>
    %c0_34 = arith.constant 0 : index
    %c0_35 = arith.constant 0 : index
    %78 = vector.load %arg5[%c0_34, %c0_35] : memref<512x1024xbf16, #tpu.memory_space<vmem>>, vector<512x1024xbf16>
    %cst_36 = arith.constant dense<0.000000e+00> : vector<8x1024xf32>
    %79 = tpu.matmul %77, %78, %cst_36 {dimension_numbers = #tpu.dot_dimension_numbers<[1], [0], [0], [1], [0, 0, 1, 1], [], []>} : vector<8x512xbf16>, vector<512x1024xbf16>, vector<8x1024xf32> -> vector<8x1024xf32>
    %cst_37 = arith.constant dense<0.000000e+00> : vector<1024xf32>
    %80 = vector.multi_reduction <add>, %79, %cst_37 [0] : vector<8x1024xf32> to vector<1024xf32>
    %81 = vector.shape_cast %80 : vector<1024xf32> to vector<1x1024xf32>
    %cst_38 = arith.constant 8.000000e+00 : f32
    %82 = vector.broadcast %cst_38 : f32 to vector<1x1024xf32>
    %83 = arith.divf %81, %82 : vector<1x1024xf32>
    %84 = arith.mulf %79, %79 : vector<8x1024xf32>
    %cst_39 = arith.constant dense<0.000000e+00> : vector<1024xf32>
    %85 = vector.multi_reduction <add>, %84, %cst_39 [0] : vector<8x1024xf32> to vector<1024xf32>
    %86 = vector.shape_cast %85 : vector<1024xf32> to vector<1x1024xf32>
    %cst_40 = arith.constant 8.000000e+00 : f32
    %87 = vector.broadcast %cst_40 : f32 to vector<1x1024xf32>
    %88 = arith.divf %86, %87 : vector<1x1024xf32>
    %89 = arith.mulf %83, %83 : vector<1x1024xf32>
    %90 = arith.subf %88, %89 : vector<1x1024xf32>
    %cst_41 = arith.constant 8.000000e-01 : f32
    %91 = vector.broadcast %cst_41 : f32 to vector<1x1024xf32>
    %92 = arith.addf %90, %91 : vector<1x1024xf32>
    %93 = math.rsqrt %92 : vector<1x1024xf32>
    %94 = arith.mulf %5, %93 : vector<1x1024xf32>
    %95 = arith.mulf %83, %94 : vector<1x1024xf32>
    %96 = arith.subf %6, %95 : vector<1x1024xf32>
    %97 = vector.broadcast %94 : vector<1x1024xf32> to vector<8x1024xf32>
    %98 = arith.mulf %79, %97 : vector<8x1024xf32>
    %99 = vector.broadcast %96 : vector<1x1024xf32> to vector<8x1024xf32>
    %100 = arith.addf %98, %99 : vector<8x1024xf32>
    %cst_42 = arith.constant 0.000000e+00 : f32
    %101 = vector.broadcast %cst_42 : f32 to vector<8x1024xf32>
    %102 = arith.cmpf ogt, %100, %101 : vector<8x1024xf32>
    %cst_43 = arith.constant 2.000000e-01 : f32
    %103 = vector.broadcast %cst_43 : f32 to vector<8x1024xf32>
    %104 = arith.mulf %103, %100 : vector<8x1024xf32>
    %105 = arith.select %102, %100, %104 : vector<8x1024xi1>, vector<8x1024xf32>
    %106 = arith.truncf %105 : vector<8x1024xf32> to vector<8x1024xbf16>
    %c0_44 = arith.constant 0 : index
    %c0_45 = arith.constant 0 : index
    %107 = vector.load %arg6[%c0_44, %c0_45] : memref<1024x128xbf16, #tpu.memory_space<vmem>>, vector<1024x128xbf16>
    %cst_46 = arith.constant dense<0.000000e+00> : vector<8x128xf32>
    %108 = tpu.matmul %106, %107, %cst_46 {dimension_numbers = #tpu.dot_dimension_numbers<[1], [0], [0], [1], [0, 0, 1, 1], [], []>} : vector<8x1024xbf16>, vector<1024x128xbf16>, vector<8x128xf32> -> vector<8x128xf32>
    %109 = vector.broadcast %7 : vector<1x128xf32> to vector<8x128xf32>
    %110 = arith.addf %108, %109 : vector<8x128xf32>
    %111 = math.tanh %110 : vector<8x128xf32>
    %c0_47 = arith.constant 0 : index
    %c0_48 = arith.constant 0 : index
    %112 = vector.load %arg8[%c0_47, %c0_48] : memref<8x128xf32, #tpu.memory_space<vmem>>, vector<8x128xf32>
    tpu.vector_store %arg8[%c0_47, %c0_48], %111 {strides = array<i32>} : memref<8x128xf32, #tpu.memory_space<vmem>>, vector<8x128xf32>,
    return
  }
  func.func @transform_0(%arg0: i32) -> (i32, i32) {
    %c0_i32 = arith.constant 0 : i32
    %c0_i32_0 = arith.constant 0 : i32
    return %arg0, %c0_i32 : i32, i32
  }
  func.func @transform_1(%arg0: i32) -> (i32, i32) {
    %c0_i32 = arith.constant 0 : i32
    %c0_i32_0 = arith.constant 0 : i32
    %c0_i32_1 = arith.constant 0 : i32
    return %c0_i32, %c0_i32_0 : i32, i32
  }
  func.func @transform_2(%arg0: i32) -> (i32, i32) {
    %c0_i32 = arith.constant 0 : i32
    %c0_i32_0 = arith.constant 0 : i32
    %c0_i32_1 = arith.constant 0 : i32
    return %c0_i32, %c0_i32_0 : i32, i32
  }
  func.func @transform_3(%arg0: i32) -> (i32, i32) {
    %c0_i32 = arith.constant 0 : i32
    %c0_i32_0 = arith.constant 0 : i32
    %c0_i32_1 = arith.constant 0 : i32
    return %c0_i32, %c0_i32_0 : i32, i32
  }
  func.func @transform_4(%arg0: i32) -> (i32, i32) {
    %c0_i32 = arith.constant 0 : i32
    %c0_i32_0 = arith.constant 0 : i32
    %c0_i32_1 = arith.constant 0 : i32
    return %c0_i32, %c0_i32_0 : i32, i32
  }
  func.func @transform_5(%arg0: i32) -> (i32, i32) {
    %c0_i32 = arith.constant 0 : i32
    %c0_i32_0 = arith.constant 0 : i32
    %c0_i32_1 = arith.constant 0 : i32
    return %c0_i32, %c0_i32_0 : i32, i32
  }
  func.func @transform_6(%arg0: i32) -> (i32, i32) {
    %c0_i32 = arith.constant 0 : i32
    %c0_i32_0 = arith.constant 0 : i32
    %c0_i32_1 = arith.constant 0 : i32
    return %c0_i32, %c0_i32_0 : i32, i32
  }
  func.func @transform_7(%arg0: i32) -> (i32, i32) {
    %c0_i32 = arith.constant 0 : i32
    %c0_i32_0 = arith.constant 0 : i32
    return %arg0, %c0_i32 : i32, i32
  }
}

</mosaic_0001>

<bundles_post_ra>
// kernel: generator_forward.1
= control target key start
LH: loop header
LB: loop body
LE: loop exit
PB: predicated region body
PF: predicated region fallthrough
CT: control target
= control target key end

     0   :  { %12 = vsyncpa [#allocation3], 0  ;;  %s5312_s0 = inlined_call_operand.hbm [shape: f32[8,32], index: 0, kind: input, shape index: {}]   ;;  %s5313_s1 = inlined_call_operand.hbm [shape: bf16[32,128], index: 1, kind: input, shape index: {}]   ;;  %s5314_s2 = inlined_call_operand.hbm [shape: bf16[128,256], index: 2, kind: input, shape index: {}]   ;;  %s5315_s3 = inlined_call_operand.hbm [shape: bf16[256,512], index: 3, kind: input, shape index: {}]   ;;  %s5316_s4 = inlined_call_operand.hbm [shape: bf16[512,1024], index: 4, kind: input, shape index: {}]   ;;  %s5317_s5 = inlined_call_operand.hbm [shape: bf16[1024,128], index: 5, kind: input, shape index: {}]   ;;  %s5318_s6 = inlined_call_operand.hbm [shape: f32[1,3840], index: 6, kind: input, shape index: {}]   ;;  %s5319_s7 = inlined_call_operand.vmem [shape: f32[8,128], index: 7, kind: output, shape index: {}]  }
   0x1   :  { %13 = vsyncpa [#allocation5], 0 }
   0x2   :  { %14 = vsyncpa [#allocation8], 0 }
   0x3   :  { %15 = vsyncpa [#allocation11], 0  ;;  %s4967_s24 = smov [#allocation4]  }
   0x4   :  { %s31_s25 = sshll.u32 %s4967_s24, 4  ;;  %s32_s25 = int_to_ptr.vmem [resolvable:$true] %s31_s25 }
   0x5   :  { %s4827_s26 = scalar_lea.vmem %s32_s25, 256  ;;  %p4832_p1 = scmp.lt.s32.totalorder %s32_s25, %s32_s25 }
   0x6   :  { %p4828_p0 = scmp.ne.s32.totalorder %s32_s25, %s4827_s26  ;;  %p4833_p2 = scmp.lt.s32.totalorder %s4827_s26, %s4827_s26 }
   0x8   :  { %p4834_p3 = por %p4833_p2, %p4832_p1 }
   0xa   :  { %p4835_p4 = pnand %p4834_p3, %p4828_p0 }
   0xc   :  { %4838 = shalt.err (!%p4835_p4)
}
   0xd   :  { %s4968_s27 = smov 64   ;;  %s4969_s28 = smov 4  }
   0xe   :  { %37 = dma.hbm_to_vmem [thread:$0]  %s5313_s1, 256, %s32_s25, [#allocation5], %s4968_s27, %s4968_s27, %s4969_s28  }
   0xf   :  { %s4970_s8 = smov [#allocation7]  }
  0x10   :  { %s55_s9 = sshll.u32 %s4970_s8, 4  ;;  %s56_s9 = int_to_ptr.vmem [resolvable:$true] %s55_s9 }
  0x11   :  { %s4847_s10 = scalar_lea.vmem %s56_s9, 8192  ;;  %p4852_p6 = scmp.lt.s32.totalorder %s56_s9, %s56_s9 }
  0x12   :  { %p4848_p5 = scmp.ne.s32.totalorder %s56_s9, %s4847_s10  ;;  %p4853_p7 = scmp.lt.s32.totalorder %s4847_s10, %s4847_s10 }
  0x14   :  { %p4854_p8 = por %p4853_p7, %p4852_p6 }
  0x16   :  { %p4855_p9 = pnand %p4854_p8, %p4848_p5 }
  0x18   :  { %4858 = shalt.err (!%p4855_p9)
}
  0x19   :  { %s4971_s11 = smov 256   ;;  %s4972_s12 = smov 16  }
  0x1a   :  { %61 = dma.hbm_to_vmem [thread:$0]  %s5315_s3, 8192, %s56_s9, [#allocation8], %s4971_s11, %s4971_s11, %s4972_s12  }
  0x1b   :  { %s4973_s15 = smov [#allocation10]   ;;  %s4974_s17 = smov [#allocation2]  }
  0x1c   :  { %s79_s16 = sshll.u32 %s4973_s15, 4  ;;  %s22_s1 = sshll.u32 %s4974_s17, 4  ;;  %s80_s16 = int_to_ptr.vmem [resolvable:$true] %s79_s16  ;;  %s23_s1 = int_to_ptr.vmem [resolvable:$true] %s22_s1 }
  0x1d   :  { %s4867_s18 = scalar_lea.vmem %s80_s16, 8192  ;;  %p4872_p11 = scmp.lt.s32.totalorder %s80_s16, %s80_s16 }
  0x1e   :  { %p4868_p10 = scmp.ne.s32.totalorder %s80_s16, %s4867_s18  ;;  %p4873_p12 = scmp.lt.s32.totalorder %s4867_s18, %s4867_s18 }
  0x20   :  { %p4874_p13 = por %p4873_p12, %p4872_p11 }
  0x22   :  { %p4875_p0 = pnand %p4874_p13, %p4868_p10 }
  0x24   :  { %4878 = shalt.err (!%p4875_p0)
}
  0x25   :  { %85 = dma.hbm_to_vmem [thread:$0]  %s5317_s5, 8192, %s80_s16, [#allocation11], %s4968_s27, %s4968_s27, %s4969_s28  }
  0x26   :  { %s4887_s3 = scalar_lea.vmem %s23_s1, 128  ;;  %p4892_p2 = scmp.lt.s32.totalorder %s23_s1, %s23_s1 }
  0x27   :  { %p4888_p1 = scmp.ne.s32.totalorder %s23_s1, %s4887_s3  ;;  %p4893_p3 = scmp.lt.s32.totalorder %s4887_s3, %s4887_s3 }
  0x29   :  { %p4894_p4 = por %p4893_p3, %p4892_p2 }
  0x2b   :  { %p4895_p5 = pnand %p4894_p4, %p4888_p1 }
  0x2d   :  { %4898 = shalt.err (!%p4895_p5)
}
  0x2e   :  { %25 = dma.hbm_to_vmem [thread:$0]  %s5312_s0, 128, %s23_s1, [#allocation3]  }
  0x2f   :  { %s4975_s23 = smov [#allocation6]  }
  0x30   :  { %s43_s24 = sshll.u32 %s4975_s23, 4  ;;  %s44_s24 = int_to_ptr.vmem [resolvable:$true] %s43_s24 }
  0x31   :  { %s4907_s25 = scalar_lea.vmem %s44_s24, 2048  ;;  %p4912_p7 = scmp.lt.s32.totalorder %s44_s24, %s44_s24 }
  0x32   :  { %p4908_p6 = scmp.ne.s32.totalorder %s44_s24, %s4907_s25  ;;  %p4913_p8 = scmp.lt.s32.totalorder %s4907_s25, %s4907_s25 }
  0x34   :  { %p4914_p9 = por %p4913_p8, %p4912_p7 }
  0x36   :  { %p4915_p10 = pnand %p4914_p9, %p4908_p6 }
  0x38   :  { %4918 = shalt.err (!%p4915_p10)
}
  0x39   :  { %s4976_s5 = smov 128   ;;  %s4977_s26 = smov 8  }
  0x3a   :  { %49 = dma.hbm_to_vmem [thread:$0]  %s5314_s2, 2048, %s44_s24, [#allocation5], %s4976_s5, %s4976_s5, %s4977_s26  }
  0x3b   :  { %s4978_s29 = smov [#allocation9]  }
  0x3c   :  { %s67_s30 = sshll.u32 %s4978_s29, 4  ;;  %s68_s30 = int_to_ptr.vmem [resolvable:$true] %s67_s30 }
  0x3d   :  { %s4927_s0 = scalar_lea.vmem %s68_s30, 32768  ;;  %p4932_p12 = scmp.lt.s32.totalorder %s68_s30, %s68_s30 }
  0x3e   :  { %p4928_p11 = scmp.ne.s32.totalorder %s68_s30, %s4927_s0  ;;  %p4933_p13 = scmp.lt.s32.totalorder %s4927_s0, %s4927_s0 }
  0x40   :  { %p4934_p0 = por %p4933_p13, %p4932_p12 }
  0x42   :  { %p4935_p1 = pnand %p4934_p0, %p4928_p11 }
  0x44   :  { %4938 = shalt.err (!%p4935_p1)
}
  0x45   :  { %s4979_s8 = smov 512   ;;  %s4980_s9 = smov 32  }
  0x46   :  { %73 = dma.hbm_to_vmem [thread:$0]  %s5316_s4, 32768, %s68_s30, [#allocation8], %s4979_s8, %s4979_s8, %s4980_s9  }
  0x47   :  { %s4981_s12 = smov [#allocation12]  }
  0x48   :  { %s92_s13 = sshll.u32 %s4981_s12, 4  ;;  %s93_s13 = int_to_ptr.vmem [resolvable:$true] %s92_s13 }
  0x49   :  { %s4947_s2 = scalar_lea.vmem %s93_s13, 480  ;;  %p4952_p3 = scmp.lt.s32.totalorder %s93_s13, %s93_s13 }
  0x4a   :  { %p4948_p2 = scmp.ne.s32.totalorder %s93_s13, %s4947_s2  ;;  %p4953_p4 = scmp.lt.s32.totalorder %s4947_s2, %s4947_s2 }
  0x4c   :  { %p4954_p5 = por %p4953_p4, %p4952_p3 }
  0x4e   :  { %p4955_p6 = pnand %p4954_p5, %p4948_p2 }
  0x50   :  { %4958 = shalt.err (!%p4955_p6)
}
  0x51   :  { %95 = dma.hbm_to_vmem [thread:$0]  %s5318_s6, 480, %s93_s13, [#allocation11]  }
  0x52   :  { %4959 = dma.done.wait [#allocation3], 128  }
  0x53   :  { %4960 = vsyncadd [#allocation3], 4294967168 }
  0x54   :  { %4961 = dma.done.wait [#allocation5], 2304  }
  0x55   :  { %4962 = vsyncadd [#allocation5], 4294964992 }
  0x56   :  { %4963 = dma.done.wait [#allocation8], 40960  }
  0x57   :  { %4964 = vsyncadd [#allocation8], 4294926336 }
  0x58   :  { %4965 = dma.done.wait [#allocation11], 8672  }
  0x59   :  { %4966 = vsyncadd [#allocation11], 4294958624  ;;  %v4982_v0 = vmov 0.0   ;;  %vm4983_vm0 = vmmov 0   ;;  %v4603_v1 = vld [vmem:[#allocation4 + $0x8] sm:$0xff]   ;;  %v4604_v2 = vld [vmem:[#allocation4] sm:$0xff]  }
  0x5a   :  { %4576 = vmatprep.subr.bf16.mxu0 %v4982_v0  ;;  %4580 = vmatprep.mubr.msk.bf16.mxu0 %vm4983_vm0, %v4982_v0  ;;  %v126_v3 = vld [vmem:[#allocation2] sm:$0xff]  ;;  %v4605_v4 = vld [vmem:[#allocation6 + $0x74] ss:$8 sps:$4 sm:$0xff]   ;;  %v4607_v5 = vld [vmem:[#allocation6 + $0x70] ss:$8 sps:$4 sm:$0xff]   ;;  %vm150_vm1 = vcmask 261120  }
  0x5b   :  { %4577 = vmatpush3.bf16.msra.mxu0 %v4603_v1  ;;  %v4608_v6 = vld [vmem:[#allocation6 + $0x64] ss:$8 sps:$4 sm:$0xff]   ;;  %v127_v7 = vpack.c.bf16 %v126_v3, %v126_v3  ;;  %294 = vmatprep.subr.bf16.mxu1 %v4605_v4  ;;  %v4610_v8 = vld [vmem:[#allocation6 + $0x60] ss:$8 sps:$4 sm:$0xff]   ;;  %v4611_v9 = vld [vmem:[#allocation6 + $0x54] ss:$8 sps:$4 sm:$0xff]  }
  0x5c   :  { %4578 = vmatprep.subr.bf16.mxu0 %v4982_v0  ;;  %295 = vmatpush1.bf16.msra.mxu1 %v4607_v5  ;;  %v4613_v10 = vld [vmem:[#allocation6 + $0x50] ss:$8 sps:$4 sm:$0xff]   ;;  %v4614_v11 = vld [vmem:[#allocation6 + $0x44] ss:$8 sps:$4 sm:$0xff]   ;;  %v4616_v12 = vld [vmem:[#allocation6 + $0x40] ss:$8 sps:$4 sm:$0xff]  }
  0x5d   :  { %296 = vmatprep.subr.bf16.mxu1 %v4608_v6  ;;  %v4617_v13 = vld [vmem:[#allocation6 + $0x34] ss:$8 sps:$4 sm:$0xff]   ;;  %v4619_v14 = vld [vmem:[#allocation6 + $0x30] ss:$8 sps:$4 sm:$0xff]   ;;  %v4620_v15 = vld [vmem:[#allocation6 + $0x24] ss:$8 sps:$4 sm:$0xff]  }
  0x5e   :  { %v4622_v16 = vld [vmem:[#allocation6 + $0x20] ss:$8 sps:$4 sm:$0xff]   ;;  %v4623_v17 = vld [vmem:[#allocation6 + $0x14] ss:$8 sps:$4 sm:$0xff]   ;;  %v4625_v18 = vld [vmem:[#allocation6 + $0x10] ss:$8 sps:$4 sm:$0xff]  }
  0x5f   :  { %4579 = vmatpush3.bf16.msra.mxu0 %v4604_v2  ;;  %v4626_v19 = vld [vmem:[#allocation6 + $0x4] ss:$8 sps:$4 sm:$0xff]   ;;  %v4628_v20 = vld [vmem:[#allocation6] ss:$8 sps:$4 sm:$0xff]   ;;  %v4984_v21 = vmov 0  }
  0x60   :  { %297 = vmatpush1.bf16.msra.mxu1 %v4610_v8  ;;  %326 = vmatprep.mubr.bf16.mxu1 %v4984_v21  ;;  %v4080_v22 = vld [vmem:[#allocation12] ss:$0 sm:$0xff]  ;;  %v4631_v31 = vld [vmem:[#allocation7 + $0xe4] ss:$16 sps:$4 sm:$0xff]   ;;  %v4634_v32 = vld [vmem:[#allocation7 + $0xec] ss:$16 sps:$4 sm:$0xff]  }
  0x61   :  { %298 = vmatprep.subr.bf16.mxu1 %v4611_v9  ;;  %v4629_v33 = vld [vmem:[#allocation7 + $0xe0] ss:$16 sps:$4 sm:$0xff]   ;;  %v4632_v34 = vld [vmem:[#allocation7 + $0xe8] ss:$16 sps:$4 sm:$0xff]   ;;  %832 = vmatprep.subr.bf16.mxu0 %v4631_v31  ;;  %v4637_v35 = vld [vmem:[#allocation7 + $0xc4] ss:$16 sps:$4 sm:$0xff]  }
  0x62   :  { %4581 = vmatmul.mubr.msk.bf16.vlgmr.msra.gmra.mxu0 %vm150_vm1, %v127_v7  ;;  %v4640_v36 = vld [vmem:[#allocation7 + $0xcc] ss:$16 sps:$4 sm:$0xff]   ;;  %v4635_v37 = vld [vmem:[#allocation7 + $0xc0] ss:$16 sps:$4 sm:$0xff]   ;;  %v4638_v38 = vld [vmem:[#allocation7 + $0xc8] ss:$16 sps:$4 sm:$0xff]  }
  0x63   :  { %833 = vmatpush1.bf16.msra.mxu0 %v4629_v33  ;;  %v4643_v39 = vld [vmem:[#allocation7 + $0xa4] ss:$16 sps:$4 sm:$0xff]   ;;  %v4646_v40 = vld [vmem:[#allocation7 + $0xac] ss:$16 sps:$4 sm:$0xff]   ;;  %v4641_v41 = vld [vmem:[#allocation7 + $0xa0] ss:$16 sps:$4 sm:$0xff]  }
  0x64   :  { %299 = vmatpush1.bf16.msra.mxu1 %v4613_v10  ;;  %834 = vmatprep.subr.bf16.mxu0 %v4637_v35  ;;  %v4644_v42 = vld [vmem:[#allocation7 + $0xa8] ss:$16 sps:$4 sm:$0xff]   ;;  %v4649_v43 = vld [vmem:[#allocation7 + $0x84] ss:$16 sps:$4 sm:$0xff]   ;;  %v4652_v44 = vld [vmem:[#allocation7 + $0x8c] ss:$16 sps:$4 sm:$0xff]  }
  0x65   :  { %300 = vmatprep.subr.bf16.mxu1 %v4614_v11  ;;  %v4647_v45 = vld [vmem:[#allocation7 + $0x80] ss:$16 sps:$4 sm:$0xff]   ;;  %v4650_v46 = vld [vmem:[#allocation7 + $0x88] ss:$16 sps:$4 sm:$0xff]   ;;  %v4655_v47 = vld [vmem:[#allocation7 + $0x64] ss:$16 sps:$4 sm:$0xff]  }
  0x66   :  { %v4658_v48 = vld [vmem:[#allocation7 + $0x6c] ss:$16 sps:$4 sm:$0xff]   ;;  %v4653_v49 = vld [vmem:[#allocation7 + $0x60] ss:$16 sps:$4 sm:$0xff]   ;;  %v4656_v50 = vld [vmem:[#allocation7 + $0x68] ss:$16 sps:$4 sm:$0xff]  }
  0x67   :  { %835 = vmatpush1.bf16.msra.mxu0 %v4635_v37  ;;  %v4661_v51 = vld [vmem:[#allocation7 + $0x44] ss:$16 sps:$4 sm:$0xff]   ;;  %v4659_v52 = vld [vmem:[#allocation7 + $0x40] ss:$16 sps:$4 sm:$0xff]   ;;  %v4662_v53 = vld [vmem:[#allocation7 + $0x48] ss:$16 sps:$4 sm:$0xff]  }
  0x68   :  { %301 = vmatpush1.bf16.msra.mxu1 %v4616_v12  ;;  %836 = vmatprep.subr.bf16.mxu0 %v4643_v39  ;;  %v4664_v54 = vld [vmem:[#allocation7 + $0x4c] ss:$16 sps:$4 sm:$0xff]   ;;  %v4667_v55 = vld [vmem:[#allocation7 + $0x24] ss:$16 sps:$4 sm:$0xff]   ;;  %v4665_v57 = vld [vmem:[#allocation7 + $0x20] ss:$16 sps:$4 sm:$0xff]  }
  0x69   :  { %302 = vmatprep.subr.bf16.mxu1 %v4617_v13  ;;  %v4670_v56 = vld [vmem:[#allocation7 + $0x2c] ss:$16 sps:$4 sm:$0xff]   ;;  %v4668_v58 = vld [vmem:[#allocation7 + $0x28] ss:$16 sps:$4 sm:$0xff]   ;;  %v4673_v59 = vld [vmem:[#allocation7 + $0x4] ss:$16 sps:$4 sm:$0xff]  }
  0x6a   :  { %v4676_v60 = vld [vmem:[#allocation7 + $0xc] ss:$16 sps:$4 sm:$0xff]   ;;  %v4671_v61 = vld [vmem:[#allocation7] ss:$16 sps:$4 sm:$0xff]   ;;  %v4674_v62 = vld [vmem:[#allocation7 + $0x8] ss:$16 sps:$4 sm:$0xff]  }
  0x6b   :  { %837 = vmatpush1.bf16.msra.mxu0 %v4641_v41  ;;  %v4679_v63 = vld [vmem:[#allocation7 + $0x1e4] ss:$16 sps:$4 sm:$0xff]   ;;  %v4682_v0 = vld [vmem:[#allocation7 + $0x1ec] ss:$16 sps:$4 sm:$0xff]   ;;  %v4677_v1 = vld [vmem:[#allocation7 + $0x1e0] ss:$16 sps:$4 sm:$0xff]  }
  0x6c   :  { %303 = vmatpush1.bf16.msra.mxu1 %v4619_v14  ;;  %838 = vmatprep.subr.bf16.mxu0 %v4649_v43  ;;  %v4680_v2 = vld [vmem:[#allocation7 + $0x1e8] ss:$16 sps:$4 sm:$0xff]   ;;  %v4685_v3 = vld [vmem:[#allocation7 + $0x1c4] ss:$16 sps:$4 sm:$0xff]   ;;  %v4688_v4 = vld [vmem:[#allocation7 + $0x1cc] ss:$16 sps:$4 sm:$0xff]  }
  0x6d   :  { %304 = vmatprep.subr.bf16.mxu1 %v4620_v15  ;;  %v4683_v5 = vld [vmem:[#allocation7 + $0x1c0] ss:$16 sps:$4 sm:$0xff]   ;;  %v4686_v6 = vld [vmem:[#allocation7 + $0x1c8] ss:$16 sps:$4 sm:$0xff]   ;;  %v4691_v7 = vld [vmem:[#allocation7 + $0x1a4] ss:$16 sps:$4 sm:$0xff]  }
  0x6e   :  { %v4694_v8 = vld [vmem:[#allocation7 + $0x1ac] ss:$16 sps:$4 sm:$0xff]   ;;  %v4689_v9 = vld [vmem:[#allocation7 + $0x1a0] ss:$16 sps:$4 sm:$0xff]   ;;  %v4692_v10 = vld [vmem:[#allocation7 + $0x1a8] ss:$16 sps:$4 sm:$0xff]  }
  0x6f   :  { %839 = vmatpush1.bf16.msra.mxu0 %v4647_v45  ;;  %v4697_v11 = vld [vmem:[#allocation7 + $0x184] ss:$16 sps:$4 sm:$0xff]   ;;  %v4700_v12 = vld [vmem:[#allocation7 + $0x18c] ss:$16 sps:$4 sm:$0xff]   ;;  %v4695_v13 = vld [vmem:[#allocation7 + $0x180] ss:$16 sps:$4 sm:$0xff]  }
  0x70   :  { %305 = vmatpush1.bf16.msra.mxu1 %v4622_v16  ;;  %840 = vmatprep.subr.bf16.mxu0 %v4655_v47  ;;  %v4698_v14 = vld [vmem:[#allocation7 + $0x188] ss:$16 sps:$4 sm:$0xff]   ;;  %v4703_v15 = vld [vmem:[#allocation7 + $0x164] ss:$16 sps:$4 sm:$0xff]   ;;  %v4706_v16 = vld [vmem:[#allocation7 + $0x16c] ss:$16 sps:$4 sm:$0xff]  }
  0x71   :  { %306 = vmatprep.subr.bf16.mxu1 %v4623_v17  ;;  %v4701_v17 = vld [vmem:[#allocation7 + $0x160] ss:$16 sps:$4 sm:$0xff]  }
  0x72   :  { %v4707_v21 = vld [vmem:[#allocation7 + $0x140] ss:$16 sps:$4 sm:$0xff]  }
  0x73   :  { %841 = vmatpush1.bf16.msra.mxu0 %v4653_v49 }
  0x74   :  { %307 = vmatpush1.bf16.msra.mxu1 %v4625_v18  ;;  %842 = vmatprep.subr.bf16.mxu0 %v4661_v51  ;;  %v4704_v18 = vld [vmem:[#allocation7 + $0x168] ss:$16 sps:$4 sm:$0xff]  }
  0x75   :  { %308 = vmatprep.subr.bf16.mxu1 %v4626_v19  ;;  %v4709_v19 = vld [vmem:[#allocation7 + $0x144] ss:$16 sps:$4 sm:$0xff]  }
  0x77   :  { %843 = vmatpush1.bf16.msra.mxu0 %v4659_v52 }
  0x78   :  { %309 = vmatpush1.bf16.msra.mxu1 %v4628_v20  ;;  %844 = vmatprep.subr.bf16.mxu0 %v4667_v55  ;;  %v4712_v20 = vld [vmem:[#allocation7 + $0x14c] ss:$16 sps:$4 sm:$0xff]  }
  0x79   :  { %873 = vmatprep.subr.bf16.mxu1 %v4634_v32 }
  0x7b   :  { %845 = vmatpush1.bf16.msra.mxu0 %v4665_v57 }
  0x7c   :  { %846 = vmatprep.subr.bf16.mxu0 %v4673_v59 }
  0x7f   :  { %847 = vmatpush1.bf16.msra.mxu0 %v4671_v61 }
  0x80   :  { %848 = vmatprep.subr.bf16.mxu0 %v4679_v63 }
  0x83   :  { %849 = vmatpush2.bf16.msra.mxu0 %v4677_v1 }
  0x84   :  { %850 = vmatprep.subr.bf16.mxu0 %v4685_v3 }
  0x87   :  { %851 = vmatpush2.bf16.msra.mxu0 %v4683_v5 }
  0x88   :  { %852 = vmatprep.subr.bf16.mxu0 %v4691_v7  ;;  %v4985_v7 = vmov 1966171168  }
  0x8b   :  { %853 = vmatpush2.bf16.msra.mxu0 %v4689_v9  ;;  %v380_v9 = vlaneseq }
  0x8c   :  { %854 = vmatprep.subr.bf16.mxu0 %v4697_v11 }
  0x8d   :  { %v5065_v11 = vshrl.u32 %v380_v9, 7 }
  0x8f   :  { %855 = vmatpush2.bf16.msra.mxu0 %v4695_v13 }
  0x90   :  { %856 = vmatprep.subr.bf16.mxu0 %v4703_v15 }
  0x93   :  { %857 = vmatpush2.bf16.msra.mxu0 %v4701_v17  ;;  %v119_v17 = vld [vmem:[#allocation12 + $0x1] sm:$0x3] }
  0x94   :  { %858 = vmatprep.subr.bf16.mxu0 %v4709_v19  ;;  %v5073_v19 = vsub.s32 0, %v5065_v11 }
  0x97   :  { %859 = vmatpush2.bf16.msra.mxu0 %v4707_v21 }
 0x122   :  { %v188_v23 = vpop.f32.mrf.mxu0 }
 0x123   :  { %v189_v24 = vadd.f32 %v4080_v22, %v188_v23  ;;  %v4710_v22 = vld [vmem:[#allocation7 + $0x148] ss:$16 sps:$4 sm:$0xff]   ;;  %v4715_v23 = vld [vmem:[#allocation7 + $0x124] ss:$16 sps:$4 sm:$0xff]  }
 0x124   :  { %v4582_v25 = vpop.f32.mrf.mxu0  ;;  %860 = vmatprep.subr.bf16.mxu0 %v4715_v23 }
 0x125   :  { %vm194_vm2 = vcmp.gt.f32.partialorder %v189_v24, 0.0  ;;  %v195_v26 = vmul.f32 0.2, %v189_v24  ;;  %v4713_v25 = vld [vmem:[#allocation7 + $0x120] ss:$16 sps:$4 sm:$0xff]  }
 0x126   :  { %v191_v27 = vpop.f32.mrf.mxu0  ;;  %861 = vmatpush2.bf16.msra.mxu0 %v4713_v25 }
 0x127   :  { %v196_v28 = vsel %vm194_vm2, %v189_v24, %v195_v26  ;;  %v4718_v24 = vld [vmem:[#allocation7 + $0x12c] ss:$16 sps:$4 sm:$0xff]   ;;  %v4716_v26 = vld [vmem:[#allocation7 + $0x128] ss:$16 sps:$4 sm:$0xff]   ;;  %v4721_v27 = vld [vmem:[#allocation7 + $0x104] ss:$16 sps:$4 sm:$0xff]  }
 0x128   :  { %v4583_v29 = vpop.f32.mrf.mxu0  ;;  %v197_v30 = vpack.c.bf16 %v196_v28, %v196_v28  ;;  %v4719_v28 = vld [vmem:[#allocation7 + $0x100] ss:$16 sps:$4 sm:$0xff]   ;;  %862 = vmatprep.subr.bf16.mxu0 %v4721_v27 }
 0x129   :  { %v4724_v29 = vld [vmem:[#allocation7 + $0x10c] ss:$16 sps:$4 sm:$0xff]  }
 0x12a   :  { %327 = vmatmul.mubr.bf16.vlgmr.msra.gmra.mxu1 %v197_v30  ;;  %v4722_v30 = vld [vmem:[#allocation7 + $0x108] ss:$16 sps:$4 sm:$0xff]   ;;  %863 = vmatpush2.bf16.msra.mxu0 %v4719_v28  ;;  %v120_v28 = vld [vmem:[#allocation12 + $0x3] sm:$0x3] }
 0x12b   :  { %874 = vmatpush1.bf16.msra.mxu1 %v4632_v34 }
 0x12c   :  { %875 = vmatprep.subr.bf16.mxu1 %v4640_v36 }
 0x12f   :  { %876 = vmatpush1.bf16.msra.mxu1 %v4638_v38 }
 0x130   :  { %877 = vmatprep.subr.bf16.mxu1 %v4646_v40 }
 0x133   :  { %878 = vmatpush1.bf16.msra.mxu1 %v4644_v42 }
 0x134   :  { %879 = vmatprep.subr.bf16.mxu1 %v4652_v44 }
 0x137   :  { %880 = vmatpush1.bf16.msra.mxu1 %v4650_v46 }
 0x138   :  { %881 = vmatprep.subr.bf16.mxu1 %v4658_v48 }
 0x13b   :  { %882 = vmatpush1.bf16.msra.mxu1 %v4656_v50 }
 0x13c   :  { %883 = vmatprep.subr.bf16.mxu1 %v4664_v54 }
 0x13f   :  { %884 = vmatpush1.bf16.msra.mxu1 %v4662_v53 }
 0x140   :  { %885 = vmatprep.subr.bf16.mxu1 %v4670_v56 }
 0x143   :  { %886 = vmatpush1.bf16.msra.mxu1 %v4668_v58 }
 0x144   :  { %887 = vmatprep.subr.bf16.mxu1 %v4676_v60 }
 0x147   :  { %888 = vmatpush1.bf16.msra.mxu1 %v4674_v62 }
 0x148   :  { %889 = vmatprep.subr.bf16.mxu1 %v4682_v0 }
 0x14b   :  { %890 = vmatpush2.bf16.msra.mxu1 %v4680_v2 }
 0x14c   :  { %891 = vmatprep.subr.bf16.mxu1 %v4688_v4 }
 0x14f   :  { %892 = vmatpush2.bf16.msra.mxu1 %v4686_v6 }
 0x150   :  { %893 = vmatprep.subr.bf16.mxu1 %v4694_v8  ;;  %v378_v8 = vunpack.c.l.s4 %v4985_v7  ;;  %v1284_v7 = vld [vmem:[#allocation9 + $0x520] sm:$0xff] }
 0x153   :  { %894 = vmatpush2.bf16.msra.mxu1 %v4692_v10  ;;  %v379_v10 = vunpack.c.0.s8 %v378_v8 }
 0x154   :  { %895 = vmatprep.subr.bf16.mxu1 %v4700_v12 }
 0x155   :  { %v5068_v13 = vsub.s32 %v379_v10, %v5065_v11 }
 0x157   :  { %896 = vmatpush2.bf16.msra.mxu1 %v4698_v14 }
 0x158   :  { %897 = vmatprep.subr.bf16.mxu1 %v4706_v16 }
 0x15b   :  { %898 = vmatpush2.bf16.msra.mxu1 %v4704_v18 }
 0x15c   :  { %899 = vmatprep.subr.bf16.mxu1 %v4712_v20  ;;  %v5076_v20 = vsub.s32 1, %v5065_v11 }
 0x15f   :  { %900 = vmatpush2.bf16.msra.mxu1 %v4710_v22 }
 0x160   :  { %901 = vmatprep.subr.bf16.mxu1 %v4718_v24 }
 0x163   :  { %902 = vmatpush2.bf16.msra.mxu1 %v4716_v26 }
 0x164   :  { %903 = vmatprep.subr.bf16.mxu1 %v4724_v29 }
 0x167   :  { %904 = vmatpush2.bf16.msra.mxu1 %v4722_v30 }
 0x1ea   :  { %v5053_v31 = vpop.f32.mrf.mxu1 }
 0x1eb   :  { %v335_v32 = vrot.slane %v5053_v31, 4  ;;  %v350_v33 = vmul.f32 %v5053_v31, %v5053_v31 }
 0x1ec   :  { %v5058_v34 = vpop.f32.mrf.mxu1 }
 0x1ed   :  { %v336_v35 = vadd.f32 %v335_v32, %v5053_v31  ;;  %v352_v36 = vrot.slane %v350_v33, 4  ;;  %v341_v37 = vrot.slane %v5058_v34, 4  ;;  %v351_v38 = vmul.f32 %v5058_v34, %v5058_v34 }
 0x1ee   :  { %v332_v39 = vpop.f32.mrf.mxu1 }
 0x1ef   :  { %v337_v40 = vrot.slane %v336_v35, 2  ;;  %v353_v41 = vadd.f32 %v352_v36, %v350_v33  ;;  %v342_v42 = vadd.f32 %v341_v37, %v5058_v34  ;;  %v358_v43 = vrot.slane %v351_v38, 4 }
 0x1f0   :  { %v333_v44 = vpop.f32.mrf.mxu1 }
 0x1f1   :  { %v338_v45 = vadd.f32 %v337_v40, %v336_v35  ;;  %v354_v46 = vrot.slane %v353_v41, 2  ;;  %v343_v47 = vrot.slane %v342_v42, 2  ;;  %v359_v48 = vadd.f32 %v358_v43, %v351_v38 }
 0x1f3   :  { %v339_v49 = vrot.slane %v338_v45, 1  ;;  %v355_v50 = vadd.f32 %v354_v46, %v353_v41  ;;  %v344_v51 = vadd.f32 %v343_v47, %v342_v42  ;;  %v360_v52 = vrot.slane %v359_v48, 2  ;;  %v1308_v47 = vld [vmem:[#allocation9 + $0x5e0] sm:$0xff] }
 0x1f5   :  { %v340_v53 = vadd.f32 %v339_v49, %v338_v45  ;;  %v356_v54 = vrot.slane %v355_v50, 1  ;;  %v345_v55 = vrot.slane %v344_v51, 1  ;;  %v361_v56 = vadd.f32 %v360_v52, %v359_v48  ;;  %v1304_v45 = vld [vmem:[#allocation9 + $0x5c0] sm:$0xff] }
 0x1f6   :  { %v4348_v49 = vcombine.low %v1304_v45, %v1308_v47  ;;  %v1172_v52 = vld [vmem:[#allocation9 + $0x1a0] sm:$0xff] }
 0x1f7   :  { %v348_v57 = vmul.f32 0.125, %v340_v53  ;;  %v357_v58 = vadd.f32 %v356_v54, %v355_v50  ;;  %v346_v59 = vadd.f32 %v345_v55, %v344_v51  ;;  %v362_v60 = vrot.slane %v361_v56, 1  ;;  %v1168_v51 = vld [vmem:[#allocation9 + $0x180] sm:$0xff] }
 0x1f8   :  { %v4349_v50 = vcombine.high %v1304_v45, %v1308_v47  ;;  %v1296_v53 = vld [vmem:[#allocation9 + $0x580] sm:$0xff]  ;;  %v4213_v54 = vcombine.high %v1168_v51, %v1172_v52 }
 0x1f9   :  { %v364_v61 = vmul.f32 0.125, %v357_v58  ;;  %v366_v62 = vmul.f32 %v348_v57, %v348_v57  ;;  %v349_v63 = vmul.f32 0.125, %v346_v59  ;;  %v363_v0 = vadd.f32 %v362_v60, %v361_v56  ;;  %v1300_v55 = vld [vmem:[#allocation9 + $0x5a0] sm:$0xff] }
 0x1fa   :  { %2697 = vmatprep.subr.bf16.mxu1 %v4349_v50  ;;  %v4212_v56 = vcombine.low %v1168_v51, %v1172_v52  ;;  %v4341_v58 = vcombine.high %v1296_v53, %v1300_v55  ;;  %v1160_v59 = vld [vmem:[#allocation9 + $0x140] sm:$0xff] }
 0x1fb   :  { %v368_v1 = vsub.f32 %v364_v61, %v366_v62  ;;  %v365_v2 = vmul.f32 0.125, %v363_v0  ;;  %v367_v3 = vmul.f32 %v349_v63, %v349_v63  ;;  %v1164_v60 = vld [vmem:[#allocation9 + $0x160] sm:$0xff] }
 0x1fc   :  { %v1288_v61 = vld [vmem:[#allocation9 + $0x540] sm:$0xff]  ;;  %v4205_v62 = vcombine.high %v1160_v59, %v1164_v60  ;;  %v4204_v0 = vcombine.low %v1160_v59, %v1164_v60 }
 0x1fd   :  { %v370_v4 = vadd.f32 0.8, %v368_v1  ;;  %v369_v5 = vsub.f32 %v365_v2, %v367_v3  ;;  %v1152_v3 = vld [vmem:[#allocation9 + $0x100] sm:$0xff] }
 0x1fe   :  { %v1240_v47 = vld [vmem:[#allocation9 + $0x3c0] sm:$0xff] }
 0x1ff   :  { %v371_v6 = vadd.f32 0.8, %v369_v5  ;;  %4789 = vrsqrt.f32 %v370_v4  ;;  %v1156_v4 = vld [vmem:[#allocation9 + $0x120] sm:$0xff] }
 0x200   :  { %v1280_v5 = vld [vmem:[#allocation9 + $0x500] sm:$0xff]  ;;  %v4196_v8 = vcombine.low %v1152_v3, %v1156_v4 }
 0x201   :  { %4791 = vrsqrt.f32 %v371_v6  ;;  %v4197_v6 = vcombine.high %v1152_v3, %v1156_v4  ;;  %v4324_v9 = vcombine.low %v1280_v5, %v1284_v7  ;;  %v4325_v10 = vcombine.high %v1280_v5, %v1284_v7  ;;  %v1372_v51 = vld [vmem:[#allocation9 + $0x7e0] sm:$0xff] }
 0x202   :  { %v1364_v59 = vld [vmem:[#allocation9 + $0x7a0] sm:$0xff] }
 0x203   :  { %v1356_v3 = vld [vmem:[#allocation9 + $0x760] sm:$0xff] }
 0x204   :  { %v1216_v7 = vld [vmem:[#allocation9 + $0x300] sm:$0xff] }
 0x20c   :  { %v4790_v12 = vpop.eup %4789 }
 0x20e   :  { %v4792_v14 = vpop.eup %4791 }
 0x20f   :  { %v376_v15 = vcombine.low %v4790_v12, %v4792_v14  ;;  %v1144_v12 = vld [vmem:[#allocation9 + $0xc0] sm:$0xff] }
 0x210   :  { %v1148_v14 = vld [vmem:[#allocation9 + $0xe0] sm:$0xff] }
 0x211   :  { %v383_v16 = vrot.slane %v376_v15, %v5068_v13  ;;  %v1272_v15 = vld [vmem:[#allocation9 + $0x4c0] sm:$0xff] }
 0x213   :  { %v390_v18 = vrot.slane %v383_v16, %v5068_v13  ;;  %v4189_v16 = vcombine.high %v1144_v12, %v1148_v14 }
 0x215   :  { %v392_v21 = vmul.f32 %v390_v18, %v119_v17  ;;  %v1276_v17 = vld [vmem:[#allocation9 + $0x4e0] sm:$0xff]  ;;  %v4188_v18 = vcombine.low %v1144_v12, %v1148_v14 }
 0x216   :  { %v1348_v12 = vld [vmem:[#allocation9 + $0x720] sm:$0xff] }
 0x217   :  { %v397_v22 = vrot.slane %v392_v21, %v5073_v19  ;;  %v401_v23 = vrot.slane %v392_v21, %v5076_v20  ;;  %v4316_v21 = vcombine.low %v1272_v15, %v1276_v17 }
 0x219   :  { %v404_v24 = vmul.f32 %v397_v22, %v348_v57  ;;  %v405_v25 = vmul.f32 %v401_v23, %v349_v63  ;;  %v425_v32 = vmul.f32 %v397_v22, %v5053_v31  ;;  %v426_v33 = vmul.f32 %v401_v23, %v5058_v34  ;;  %v1176_v31 = vld [vmem:[#allocation9 + $0x1c0] sm:$0xff] }
 0x21a   :  { %v1180_v34 = vld [vmem:[#allocation9 + $0x1e0] sm:$0xff]  ;;  %v4340_v57 = vcombine.low %v1296_v53, %v1300_v55  ;;  %v4317_v22 = vcombine.high %v1272_v15, %v1276_v17 }
 0x21b   :  { %v408_v26 = vcombine.low %v404_v24, %v405_v25  ;;  %v4221_v46 = vcombine.high %v1176_v31, %v1180_v34  ;;  %v4220_v48 = vcombine.low %v1176_v31, %v1180_v34  ;;  %v1292_v63 = vld [vmem:[#allocation9 + $0x560] sm:$0xff] }
 0x21c   :  { %v4332_v1 = vcombine.low %v1288_v61, %v1292_v63  ;;  %v4333_v2 = vcombine.high %v1288_v61, %v1292_v63  ;;  %v1136_v23 = vld [vmem:[#allocation9 + $0x80] sm:$0xff] }
 0x21d   :  { %v415_v27 = vrot.slane %v408_v26, %v5068_v13  ;;  %2656 = vmatprep.subr.bf16.mxu0 %v4221_v46  ;;  %v1140_v24 = vld [vmem:[#allocation9 + $0xa0] sm:$0xff] }
 0x21e   :  { %v1264_v25 = vld [vmem:[#allocation9 + $0x480] sm:$0xff]  ;;  %v4181_v26 = vcombine.high %v1136_v23, %v1140_v24 }
 0x21f   :  { %v422_v29 = vrot.slane %v415_v27, %v5068_v13  ;;  %v1268_v27 = vld [vmem:[#allocation9 + $0x4a0] sm:$0xff] }
 0x220   :  { %v1252_v31 = vld [vmem:[#allocation9 + $0x420] sm:$0xff] }
 0x221   :  { %v424_v30 = vsub.f32 %v120_v28, %v422_v29  ;;  %v4180_v28 = vcombine.low %v1136_v23, %v1140_v24  ;;  %v4308_v29 = vcombine.low %v1264_v25, %v1268_v27  ;;  %v1232_v55 = vld [vmem:[#allocation9 + $0x380] sm:$0xff] }
 0x222   :  { %v1224_v63 = vld [vmem:[#allocation9 + $0x340] sm:$0xff] }
 0x223   :  { %v431_v35 = vrot.slane %v424_v30, %v5073_v19  ;;  %v435_v36 = vrot.slane %v424_v30, %v5076_v20  ;;  %v4309_v30 = vcombine.high %v1264_v25, %v1268_v27  ;;  %v1208_v17 = vld [vmem:[#allocation9 + $0x2c0] sm:$0xff] }
 0x224   :  { %v1340_v23 = vld [vmem:[#allocation9 + $0x6e0] sm:$0xff] }
 0x225   :  { %v439_v37 = vadd.f32 %v435_v36, %v426_v33  ;;  %v438_v38 = vadd.f32 %v431_v35, %v425_v32  ;;  %v1128_v32 = vld [vmem:[#allocation9 + $0x40] sm:$0xff] }
 0x226   :  { %v1132_v33 = vld [vmem:[#allocation9 + $0x60] sm:$0xff] }
 0x227   :  { %vm441_vm3 = vcmp.gt.f32.partialorder %v439_v37, 0.0  ;;  %v443_v39 = vmul.f32 0.2, %v439_v37  ;;  %vm440_vm4 = vcmp.gt.f32.partialorder %v438_v38, 0.0  ;;  %v442_v40 = vmul.f32 0.2, %v438_v38 }
 0x228   :  { %v1256_v35 = vld [vmem:[#allocation9 + $0x440] sm:$0xff]  ;;  %v4173_v36 = vcombine.high %v1128_v32, %v1132_v33 }
 0x229   :  { %v445_v41 = vsel %vm441_vm3, %v439_v37, %v443_v39  ;;  %v444_v42 = vsel %vm440_vm4, %v438_v38, %v442_v40  ;;  %v1260_v37 = vld [vmem:[#allocation9 + $0x460] sm:$0xff]  ;;  %v4172_v38 = vcombine.low %v1128_v32, %v1132_v33 }
 0x22a   :  { %v447_v43 = vpack.c.bf16 %v445_v41, %v445_v41  ;;  %v446_v44 = vpack.c.bf16 %v444_v42, %v444_v42  ;;  %v4300_v39 = vcombine.low %v1256_v35, %v1260_v37  ;;  %v4301_v40 = vcombine.high %v1256_v35, %v1260_v37  ;;  %v1120_v41 = vld [vmem:[#allocation9] sm:$0xff] }
 0x22b   :  { %v1124_v42 = vld [vmem:[#allocation9 + $0x20] sm:$0xff] }
 0x22c   :  { %864 = vmatprep.mubr.bf16.mxu0 %v447_v43  ;;  %905 = vmatprep.mubr.bf16.mxu1 %v447_v43  ;;  %v1248_v43 = vld [vmem:[#allocation9 + $0x400] sm:$0xff]  ;;  %v4164_v34 = vcombine.low %v1120_v41, %v1124_v42 }
 0x22d   :  { %865 = vmatmul.mubr.bf16.vlgmr.msra.gmra.mxu0 %v446_v44  ;;  %906 = vmatmul.mubr.bf16.vlgmr.msra.gmra.mxu1 %v446_v44  ;;  %v4165_v44 = vcombine.high %v1120_v41, %v1124_v42  ;;  %v4292_v45 = vcombine.low %v1248_v43, %v1252_v31  ;;  %v4293_v46 = vcombine.high %v1248_v43, %v1252_v31  ;;  %v1200_v27 = vld [vmem:[#allocation9 + $0x280] sm:$0xff] }
 0x22e   :  { %2657 = vmatpush1.bf16.msra.mxu0 %v4220_v48  ;;  %2698 = vmatpush1.bf16.msra.mxu1 %v4348_v49  ;;  %v1244_v48 = vld [vmem:[#allocation9 + $0x3e0] sm:$0xff] }
 0x22f   :  { %2658 = vmatprep.subr.bf16.mxu0 %v4213_v54  ;;  %2699 = vmatprep.subr.bf16.mxu1 %v4341_v58  ;;  %v1368_v49 = vld [vmem:[#allocation9 + $0x7c0] sm:$0xff]  ;;  %v4285_v50 = vcombine.high %v1240_v47, %v1244_v48  ;;  %v4284_v52 = vcombine.low %v1240_v47, %v1244_v48 }
 0x230   :  { %v4412_v53 = vcombine.low %v1368_v49, %v1372_v51  ;;  %v4413_v54 = vcombine.high %v1368_v49, %v1372_v51  ;;  %v1332_v32 = vld [vmem:[#allocation9 + $0x6a0] sm:$0xff]  ;;  %v5086_v51 = vld [vmem:[#allocation9 + $0x1c8] sm:$0xff] }
 0x231   :  { %v1192_v37 = vld [vmem:[#allocation9 + $0x240] sm:$0xff] }
 0x232   :  { %2659 = vmatpush1.bf16.msra.mxu0 %v4212_v56  ;;  %2700 = vmatpush1.bf16.msra.mxu1 %v4340_v57  ;;  %v1236_v56 = vld [vmem:[#allocation9 + $0x3a0] sm:$0xff] }
 0x233   :  { %2660 = vmatprep.subr.bf16.mxu0 %v4205_v62  ;;  %2701 = vmatprep.subr.bf16.mxu1 %v4333_v2  ;;  %v1360_v57 = vld [vmem:[#allocation9 + $0x780] sm:$0xff]  ;;  %v4277_v58 = vcombine.high %v1232_v55, %v1236_v56  ;;  %v4276_v60 = vcombine.low %v1232_v55, %v1236_v56  ;;  %v5094_v55 = vld [vmem:[#allocation9 + $0x5e8] sm:$0xff] }
 0x234   :  { %v4404_v61 = vcombine.low %v1360_v57, %v1364_v59  ;;  %v4405_v62 = vcombine.high %v1360_v57, %v1364_v59  ;;  %v1324_v41 = vld [vmem:[#allocation9 + $0x660] sm:$0xff] }
 0x235   :  { %v1184_v31 = vld [vmem:[#allocation9 + $0x200] sm:$0xff] }
 0x236   :  { %2661 = vmatpush1.bf16.msra.mxu0 %v4204_v0  ;;  %2702 = vmatpush1.bf16.msra.mxu1 %v4332_v1  ;;  %v1228_v0 = vld [vmem:[#allocation9 + $0x360] sm:$0xff] }
 0x237   :  { %2662 = vmatprep.subr.bf16.mxu0 %v4197_v6  ;;  %2703 = vmatprep.subr.bf16.mxu1 %v4325_v10  ;;  %v1352_v1 = vld [vmem:[#allocation9 + $0x740] sm:$0xff]  ;;  %v4269_v2 = vcombine.high %v1224_v63, %v1228_v0  ;;  %v4268_v4 = vcombine.low %v1224_v63, %v1228_v0 }
 0x238   :  { %v4396_v5 = vcombine.low %v1352_v1, %v1356_v3  ;;  %v4397_v6 = vcombine.high %v1352_v1, %v1356_v3  ;;  %v1316_v48 = vld [vmem:[#allocation9 + $0x620] sm:$0xff] }
 0x23a   :  { %2663 = vmatpush1.bf16.msra.mxu0 %v4196_v8  ;;  %2704 = vmatpush1.bf16.msra.mxu1 %v4324_v9  ;;  %v1220_v8 = vld [vmem:[#allocation9 + $0x320] sm:$0xff] }
 0x23b   :  { %2664 = vmatprep.subr.bf16.mxu0 %v4189_v16  ;;  %2705 = vmatprep.subr.bf16.mxu1 %v4317_v22  ;;  %v1344_v9 = vld [vmem:[#allocation9 + $0x700] sm:$0xff]  ;;  %v4261_v10 = vcombine.high %v1216_v7, %v1220_v8  ;;  %v4260_v14 = vcombine.low %v1216_v7, %v1220_v8 }
 0x23c   :  { %v4388_v15 = vcombine.low %v1344_v9, %v1348_v12  ;;  %v4389_v16 = vcombine.high %v1344_v9, %v1348_v12 }
 0x23e   :  { %2665 = vmatpush1.bf16.msra.mxu0 %v4188_v18  ;;  %2706 = vmatpush1.bf16.msra.mxu1 %v4316_v21  ;;  %v1212_v18 = vld [vmem:[#allocation9 + $0x2e0] sm:$0xff] }
 0x23f   :  { %2666 = vmatprep.subr.bf16.mxu0 %v4181_v26  ;;  %2707 = vmatprep.subr.bf16.mxu1 %v4309_v30  ;;  %v1336_v21 = vld [vmem:[#allocation9 + $0x6c0] sm:$0xff]  ;;  %v4253_v22 = vcombine.high %v1208_v17, %v1212_v18  ;;  %v4252_v24 = vcombine.low %v1208_v17, %v1212_v18 }
 0x240   :  { %v4380_v25 = vcombine.low %v1336_v21, %v1340_v23  ;;  %v4381_v26 = vcombine.high %v1336_v21, %v1340_v23 }
 0x242   :  { %2667 = vmatpush1.bf16.msra.mxu0 %v4180_v28  ;;  %2708 = vmatpush1.bf16.msra.mxu1 %v4308_v29  ;;  %v1204_v28 = vld [vmem:[#allocation9 + $0x2a0] sm:$0xff] }
 0x243   :  { %2668 = vmatprep.subr.bf16.mxu0 %v4173_v36  ;;  %2709 = vmatprep.subr.bf16.mxu1 %v4301_v40  ;;  %v1328_v29 = vld [vmem:[#allocation9 + $0x680] sm:$0xff]  ;;  %v4245_v30 = vcombine.high %v1200_v27, %v1204_v28  ;;  %v4244_v33 = vcombine.low %v1200_v27, %v1204_v28 }
 0x244   :  { %v4372_v35 = vcombine.low %v1328_v29, %v1332_v32  ;;  %v4373_v36 = vcombine.high %v1328_v29, %v1332_v32 }
 0x246   :  { %2669 = vmatpush1.bf16.msra.mxu0 %v4172_v38  ;;  %2710 = vmatpush1.bf16.msra.mxu1 %v4300_v39  ;;  %v1196_v38 = vld [vmem:[#allocation9 + $0x260] sm:$0xff] }
 0x247   :  { %2670 = vmatprep.subr.bf16.mxu0 %v4165_v44  ;;  %2711 = vmatprep.subr.bf16.mxu1 %v4293_v46  ;;  %v1320_v39 = vld [vmem:[#allocation9 + $0x640] sm:$0xff]  ;;  %v4237_v40 = vcombine.high %v1192_v37, %v1196_v38  ;;  %v4236_v42 = vcombine.low %v1192_v37, %v1196_v38 }
 0x248   :  { %v4364_v43 = vcombine.low %v1320_v39, %v1324_v41  ;;  %v4365_v44 = vcombine.high %v1320_v39, %v1324_v41 }
 0x24a   :  { %2671 = vmatpush1.bf16.msra.mxu0 %v4164_v34  ;;  %2712 = vmatpush1.bf16.msra.mxu1 %v4292_v45  ;;  %v1188_v34 = vld [vmem:[#allocation9 + $0x220] sm:$0xff] }
 0x24b   :  { %2672 = vmatprep.subr.bf16.mxu0 %v4285_v50  ;;  %2713 = vmatprep.subr.bf16.mxu1 %v4413_v54  ;;  %v1312_v45 = vld [vmem:[#allocation9 + $0x600] sm:$0xff]  ;;  %v4228_v46 = vcombine.low %v1184_v31, %v1188_v34  ;;  %v4229_v47 = vcombine.high %v1184_v31, %v1188_v34 }
 0x24c   :  { %v4356_v49 = vcombine.low %v1312_v45, %v1316_v48  ;;  %v4357_v50 = vcombine.high %v1312_v45, %v1316_v48 }
 0x24e   :  { %2673 = vmatpush2.bf16.msra.mxu0 %v4284_v52  ;;  %2714 = vmatpush2.bf16.msra.mxu1 %v4412_v53  ;;  %v5088_v52 = vld [vmem:[#allocation9 + $0x1e8] sm:$0xff] }
 0x24f   :  { %2674 = vmatprep.subr.bf16.mxu0 %v4277_v58  ;;  %2715 = vmatprep.subr.bf16.mxu1 %v4405_v62  ;;  %v5090_v53 = vld [vmem:[#allocation9 + $0x5c8] sm:$0xff]  ;;  %v4223_v54 = vcombine.high %v5086_v51, %v5088_v52  ;;  %v4222_v56 = vcombine.low %v5086_v51, %v5088_v52 }
 0x250   :  { %v4350_v57 = vcombine.low %v5090_v53, %v5094_v55  ;;  %v4351_v58 = vcombine.high %v5090_v53, %v5094_v55 }
 0x252   :  { %2675 = vmatpush2.bf16.msra.mxu0 %v4276_v60  ;;  %2716 = vmatpush2.bf16.msra.mxu1 %v4404_v61 }
 0x253   :  { %2676 = vmatprep.subr.bf16.mxu0 %v4269_v2  ;;  %2717 = vmatprep.subr.bf16.mxu1 %v4397_v6 }
 0x256   :  { %2677 = vmatpush2.bf16.msra.mxu0 %v4268_v4  ;;  %2718 = vmatpush2.bf16.msra.mxu1 %v4396_v5 }
 0x257   :  { %2678 = vmatprep.subr.bf16.mxu0 %v4261_v10  ;;  %2719 = vmatprep.subr.bf16.mxu1 %v4389_v16 }
 0x25a   :  { %2679 = vmatpush2.bf16.msra.mxu0 %v4260_v14  ;;  %2720 = vmatpush2.bf16.msra.mxu1 %v4388_v15 }
 0x25b   :  { %2680 = vmatprep.subr.bf16.mxu0 %v4253_v22  ;;  %2721 = vmatprep.subr.bf16.mxu1 %v4381_v26 }
 0x25e   :  { %2681 = vmatpush2.bf16.msra.mxu0 %v4252_v24  ;;  %2722 = vmatpush2.bf16.msra.mxu1 %v4380_v25 }
 0x25f   :  { %2682 = vmatprep.subr.bf16.mxu0 %v4245_v30  ;;  %2723 = vmatprep.subr.bf16.mxu1 %v4373_v36 }
 0x262   :  { %2683 = vmatpush2.bf16.msra.mxu0 %v4244_v33  ;;  %2724 = vmatpush2.bf16.msra.mxu1 %v4372_v35 }
 0x263   :  { %2684 = vmatprep.subr.bf16.mxu0 %v4237_v40  ;;  %2725 = vmatprep.subr.bf16.mxu1 %v4365_v44 }
 0x266   :  { %2685 = vmatpush2.bf16.msra.mxu0 %v4236_v42  ;;  %2726 = vmatpush2.bf16.msra.mxu1 %v4364_v43 }
 0x267   :  { %2686 = vmatprep.subr.bf16.mxu0 %v4229_v47  ;;  %2727 = vmatprep.subr.bf16.mxu1 %v4357_v50 }
 0x26a   :  { %2687 = vmatpush2.bf16.msra.mxu0 %v4228_v46  ;;  %2728 = vmatpush2.bf16.msra.mxu1 %v4356_v49 }
 0x26b   :  { %2738 = vmatprep.subr.bf16.mxu0 %v4223_v54  ;;  %2779 = vmatprep.subr.bf16.mxu1 %v4351_v58 }
 0x2ed   :  { %v5102_v59 = vpop.f32.mrf.mxu0  ;;  %v5104_v60 = vpop.f32.mrf.mxu1 }
 0x2ee   :  { %v914_v61 = vrot.slane %v5102_v59, 4  ;;  %v942_v62 = vmul.f32 %v5102_v59, %v5102_v59  ;;  %v926_v63 = vrot.slane %v5104_v60, 4  ;;  %v944_v0 = vmul.f32 %v5104_v60, %v5104_v60 }
 0x2ef   :  { %v5112_v1 = vpop.f32.mrf.mxu0  ;;  %v5114_v2 = vpop.f32.mrf.mxu1 }
 0x2f0   :  { %v915_v3 = vadd.f32 %v914_v61, %v5102_v59  ;;  %v946_v4 = vrot.slane %v942_v62, 4  ;;  %v927_v5 = vadd.f32 %v926_v63, %v5104_v60  ;;  %v958_v6 = vrot.slane %v944_v0, 4 }
 0x2f1   :  { %v920_v7 = vrot.slane %v5112_v1, 4  ;;  %v943_v8 = vmul.f32 %v5112_v1, %v5112_v1  ;;  %v932_v9 = vrot.slane %v5114_v2, 4  ;;  %v945_v10 = vmul.f32 %v5114_v2, %v5114_v2  ;;  %v870_v12 = vpop.f32.mrf.mxu0  ;;  %v911_v14 = vpop.f32.mrf.mxu1 }
 0x2f2   :  { %v916_v15 = vrot.slane %v915_v3, 2  ;;  %v947_v16 = vadd.f32 %v946_v4, %v942_v62  ;;  %v928_v17 = vrot.slane %v927_v5, 2  ;;  %v959_v18 = vadd.f32 %v958_v6, %v944_v0 }
 0x2f3   :  { %v921_v21 = vadd.f32 %v920_v7, %v5112_v1  ;;  %v952_v22 = vrot.slane %v943_v8, 4  ;;  %v933_v23 = vadd.f32 %v932_v9, %v5114_v2  ;;  %v964_v24 = vrot.slane %v945_v10, 4  ;;  %v871_v25 = vpop.f32.mrf.mxu0  ;;  %v912_v26 = vpop.f32.mrf.mxu1 }
 0x2f4   :  { %v917_v27 = vadd.f32 %v916_v15, %v915_v3  ;;  %v948_v28 = vrot.slane %v947_v16, 2  ;;  %v929_v29 = vadd.f32 %v928_v17, %v927_v5  ;;  %v960_v30 = vrot.slane %v959_v18, 2 }
 0x2f5   :  { %v922_v32 = vrot.slane %v921_v21, 2  ;;  %v953_v33 = vadd.f32 %v952_v22, %v943_v8  ;;  %v934_v35 = vrot.slane %v933_v23, 2  ;;  %v965_v36 = vadd.f32 %v964_v24, %v945_v10 }
 0x2f6   :  { %v918_v37 = vrot.slane %v917_v27, 1  ;;  %v949_v38 = vadd.f32 %v948_v28, %v947_v16  ;;  %v930_v39 = vrot.slane %v929_v29, 1  ;;  %v961_v40 = vadd.f32 %v960_v30, %v959_v18 }
 0x2f7   :  { %v923_v41 = vadd.f32 %v922_v32, %v921_v21  ;;  %v954_v42 = vrot.slane %v953_v33, 2  ;;  %v935_v43 = vadd.f32 %v934_v35, %v933_v23  ;;  %v966_v44 = vrot.slane %v965_v36, 2 }
 0x2f8   :  { %v919_v31 = vadd.f32 %v918_v37, %v917_v27  ;;  %v950_v34 = vrot.slane %v949_v38, 1  ;;  %v931_v45 = vadd.f32 %v930_v39, %v929_v29  ;;  %v962_v46 = vrot.slane %v961_v40, 1 }
 0x2f9   :  { %v924_v47 = vrot.slane %v923_v41, 1  ;;  %v955_v48 = vadd.f32 %v954_v42, %v953_v33  ;;  %v936_v49 = vrot.slane %v935_v43, 1  ;;  %v967_v50 = vadd.f32 %v966_v44, %v965_v36 }
 0x2fa   :  { %v938_v54 = vmul.f32 0.125, %v919_v31  ;;  %v951_v58 = vadd.f32 %v950_v34, %v949_v38  ;;  %v940_v61 = vmul.f32 0.125, %v931_v45  ;;  %v963_v62 = vadd.f32 %v962_v46, %v961_v40  ;;  %v121_v40 = vld [vmem:[#allocation12 + $0x5] sm:$0xf] }
 0x2fb   :  { %v925_v63 = vadd.f32 %v924_v47, %v923_v41  ;;  %v956_v0 = vrot.slane %v955_v48, 1  ;;  %v937_v3 = vadd.f32 %v936_v49, %v935_v43  ;;  %v968_v4 = vrot.slane %v967_v50, 1 }
 0x2fc   :  { %v970_v5 = vmul.f32 0.125, %v951_v58  ;;  %v974_v6 = vmul.f32 %v938_v54, %v938_v54  ;;  %v972_v7 = vmul.f32 0.125, %v963_v62  ;;  %v976_v8 = vmul.f32 %v940_v61, %v940_v61 }
 0x2fd   :  { %v939_v9 = vmul.f32 0.125, %v925_v63  ;;  %v957_v10 = vadd.f32 %v956_v0, %v955_v48  ;;  %v941_v12 = vmul.f32 0.125, %v937_v3  ;;  %v969_v14 = vadd.f32 %v968_v4, %v967_v50  ;;  %v122_v4 = vld [vmem:[#allocation12 + $0x9] sm:$0xf] }
 0x2fe   :  { %v978_v15 = vsub.f32 %v970_v5, %v974_v6  ;;  %v980_v16 = vsub.f32 %v972_v7, %v976_v8  ;;  %v5130_v42 = vsub.s32 2, %v5065_v11  ;;  %v5133_v43 = vsub.s32 3, %v5065_v11 }
 0x2ff   :  { %v971_v17 = vmul.f32 0.125, %v957_v10  ;;  %v975_v18 = vmul.f32 %v939_v9, %v939_v9  ;;  %v973_v21 = vmul.f32 0.125, %v969_v14  ;;  %v977_v22 = vmul.f32 %v941_v12, %v941_v12 }
 0x300   :  { %v982_v23 = vadd.f32 0.8, %v978_v15  ;;  %v984_v24 = vadd.f32 0.8, %v980_v16 }
 0x301   :  { %v979_v25 = vsub.f32 %v971_v17, %v975_v18  ;;  %v981_v26 = vsub.f32 %v973_v21, %v977_v22  ;;  %v1169_v21 = vld [vmem:[#allocation9 + $0x188] sm:$0xff] }
 0x302   :  { %4793 = vrsqrt.f32 %v982_v23 }
 0x303   :  { %v983_v27 = vadd.f32 0.8, %v979_v25  ;;  %v985_v28 = vadd.f32 0.8, %v981_v26  ;;  %4795 = vrsqrt.f32 %v984_v24  ;;  %v1173_v24 = vld [vmem:[#allocation9 + $0x1a8] sm:$0xff] }
 0x304   :  { %v1297_v25 = vld [vmem:[#allocation9 + $0x588] sm:$0xff] }
 0x305   :  { %4797 = vrsqrt.f32 %v983_v27  ;;  %v1301_v26 = vld [vmem:[#allocation9 + $0x5a8] sm:$0xff] }
 0x306   :  { %4799 = vrsqrt.f32 %v985_v28 }
 0x30f   :  { %v4794_v29 = vpop.eup %4793 }
 0x310   :  { %v4796_v30 = vpop.eup %4795 }
 0x312   :  { %v4798_v32 = vpop.eup %4797 }
 0x313   :  { %v4800_v33 = vpop.eup %4799  ;;  %v994_v35 = vcombine.low %v4794_v29, %v4798_v32 }
 0x314   :  { %v995_v36 = vcombine.low %v4796_v30, %v4800_v33 }
 0x315   :  { %v1002_v37 = vrot.slane %v994_v35, %v5068_v13  ;;  %v1161_v35 = vld [vmem:[#allocation9 + $0x148] sm:$0xff] }
 0x316   :  { %v1009_v38 = vrot.slane %v995_v36, %v5068_v13  ;;  %v4215_v36 = vcombine.high %v1169_v21, %v1173_v24 }
 0x318   :  { %v1010_v39 = vcombine.low %v1002_v37, %v1009_v38  ;;  %v4343_v37 = vcombine.high %v1297_v25, %v1301_v26  ;;  %v1165_v38 = vld [vmem:[#allocation9 + $0x168] sm:$0xff] }
 0x319   :  { %v4206_v51 = vcombine.low %v1161_v35, %v1165_v38 }
 0x31a   :  { %v1017_v41 = vrot.slane %v1010_v39, %v5068_v13  ;;  %v1289_v39 = vld [vmem:[#allocation9 + $0x548] sm:$0xff] }
 0x31c   :  { %v1019_v44 = vmul.f32 %v1017_v41, %v121_v40  ;;  %v1293_v40 = vld [vmem:[#allocation9 + $0x568] sm:$0xff]  ;;  %v4214_v41 = vcombine.low %v1169_v21, %v1173_v24 }
 0x31d   :  { %v4334_v52 = vcombine.low %v1289_v39, %v1293_v40  ;;  %v1249_v21 = vld [vmem:[#allocation9 + $0x408] sm:$0xff] }
 0x31e   :  { %v1024_v31 = vrot.slane %v1019_v44, %v5073_v19  ;;  %v1028_v34 = vrot.slane %v1019_v44, %v5076_v20  ;;  %v1032_v45 = vrot.slane %v1019_v44, %v5130_v42  ;;  %v1036_v46 = vrot.slane %v1019_v44, %v5133_v43 }
 0x31f   :  { %v4342_v44 = vcombine.low %v1297_v25, %v1301_v26  ;;  %v1241_v25 = vld [vmem:[#allocation9 + $0x3c8] sm:$0xff] }
 0x320   :  { %v1041_v47 = vmul.f32 %v1024_v31, %v938_v54  ;;  %v1042_v48 = vmul.f32 %v1028_v34, %v939_v9  ;;  %v1043_v49 = vmul.f32 %v1032_v45, %v940_v61  ;;  %v1044_v50 = vmul.f32 %v1036_v46, %v941_v12  ;;  %v1245_v26 = vld [vmem:[#allocation9 + $0x3e8] sm:$0xff] }
 0x321   :  { %v1078_v7 = vmul.f32 %v1036_v46, %v5114_v2  ;;  %v1076_v8 = vmul.f32 %v1028_v34, %v5112_v1  ;;  %v1075_v54 = vmul.f32 %v1024_v31, %v5102_v59  ;;  %v1077_v61 = vmul.f32 %v1032_v45, %v5104_v60  ;;  %v1153_v45 = vld [vmem:[#allocation9 + $0x108] sm:$0xff] }
 0x322   :  { %v1049_v58 = vcombine.low %v1041_v47, %v1042_v48  ;;  %v1050_v62 = vcombine.low %v1043_v49, %v1044_v50  ;;  %v4207_v31 = vcombine.high %v1161_v35, %v1165_v38  ;;  %v4335_v34 = vcombine.high %v1289_v39, %v1293_v40  ;;  %v1157_v46 = vld [vmem:[#allocation9 + $0x128] sm:$0xff] }
 0x323   :  { %v1281_v47 = vld [vmem:[#allocation9 + $0x508] sm:$0xff]  ;;  %v4199_v53 = vcombine.high %v1153_v45, %v1157_v46 }
 0x324   :  { %v1057_v63 = vrot.slane %v1049_v58, %v5068_v13  ;;  %v1064_v0 = vrot.slane %v1050_v62, %v5068_v13  ;;  %v1285_v48 = vld [vmem:[#allocation9 + $0x528] sm:$0xff]  ;;  %v4198_v58 = vcombine.low %v1153_v45, %v1157_v46 }
 0x325   :  { %v4327_v55 = vcombine.high %v1281_v47, %v1285_v48  ;;  %v1273_v49 = vld [vmem:[#allocation9 + $0x4c8] sm:$0xff]  ;;  %v4326_v62 = vcombine.low %v1281_v47, %v1285_v48 }
 0x326   :  { %v1065_v3 = vcombine.low %v1057_v63, %v1064_v0  ;;  %v1277_v50 = vld [vmem:[#allocation9 + $0x4e8] sm:$0xff] }
 0x327   :  { %v4319_v0 = vcombine.high %v1273_v49, %v1277_v50  ;;  %v1233_v39 = vld [vmem:[#allocation9 + $0x388] sm:$0xff] }
 0x328   :  { %v1072_v5 = vrot.slane %v1065_v3, %v5068_v13  ;;  %v1137_v3 = vld [vmem:[#allocation9 + $0x88] sm:$0xff] }
 0x329   :  { %v1237_v40 = vld [vmem:[#allocation9 + $0x3a8] sm:$0xff] }
 0x32a   :  { %v1074_v6 = vsub.f32 %v122_v4, %v1072_v5  ;;  %v1141_v4 = vld [vmem:[#allocation9 + $0xa8] sm:$0xff]  ;;  %v4279_v45 = vcombine.high %v1233_v39, %v1237_v40 }
 0x32b   :  { %v1265_v5 = vld [vmem:[#allocation9 + $0x488] sm:$0xff] }
 0x32c   :  { %v1095_v9 = vrot.slane %v1074_v6, %v5133_v43  ;;  %v1087_v10 = vrot.slane %v1074_v6, %v5076_v20  ;;  %v1083_v12 = vrot.slane %v1074_v6, %v5073_v19  ;;  %v1091_v14 = vrot.slane %v1074_v6, %v5130_v42  ;;  %v1269_v6 = vld [vmem:[#allocation9 + $0x4a8] sm:$0xff] }
 0x32d   :  { %v1225_v47 = vld [vmem:[#allocation9 + $0x348] sm:$0xff] }
 0x32e   :  { %v1103_v15 = vadd.f32 %v1095_v9, %v1078_v7  ;;  %v1101_v16 = vadd.f32 %v1087_v10, %v1076_v8  ;;  %v1100_v17 = vadd.f32 %v1083_v12, %v1075_v54  ;;  %v1102_v18 = vadd.f32 %v1091_v14, %v1077_v61  ;;  %v1129_v9 = vld [vmem:[#allocation9 + $0x48] sm:$0xff] }
 0x32f   :  { %v4318_v8 = vcombine.low %v1273_v49, %v1277_v50  ;;  %v4183_v54 = vcombine.high %v1137_v3, %v1141_v4  ;;  %v4311_v61 = vcombine.high %v1265_v5, %v1269_v6  ;;  %v1133_v10 = vld [vmem:[#allocation9 + $0x68] sm:$0xff] }
 0x330   :  { %vm1105_vm5 = vcmp.gt.f32.partialorder %v1101_v16, 0.0  ;;  %v1109_v2 = vmul.f32 0.2, %v1101_v16  ;;  %vm1107_vm6 = vcmp.gt.f32.partialorder %v1103_v15, 0.0  ;;  %v1111_v1 = vmul.f32 0.2, %v1103_v15 }
 0x331   :  { %vm1104_vm7 = vcmp.gt.f32.partialorder %v1100_v17, 0.0  ;;  %v1108_v59 = vmul.f32 0.2, %v1100_v17  ;;  %vm1106_vm8 = vcmp.gt.f32.partialorder %v1102_v18, 0.0  ;;  %v1110_v60 = vmul.f32 0.2, %v1102_v18 }
 0x332   :  { %v1113_v22 = vsel %vm1105_vm5, %v1101_v16, %v1109_v2  ;;  %v1115_v23 = vsel %vm1107_vm6, %v1103_v15, %v1111_v1  ;;  %v1257_v12 = vld [vmem:[#allocation9 + $0x448] sm:$0xff]  ;;  %v4182_v15 = vcombine.low %v1137_v3, %v1141_v4  ;;  %v4310_v16 = vcombine.low %v1265_v5, %v1269_v6 }
 0x333   :  { %v5150_v27 = vpack.c.bf16 %v1113_v22, %v1113_v22  ;;  %v5152_v28 = vpack.c.bf16 %v1115_v23, %v1115_v23  ;;  %v1112_v29 = vsel %vm1104_vm7, %v1100_v17, %v1108_v59  ;;  %v1114_v30 = vsel %vm1106_vm8, %v1102_v18, %v1110_v60  ;;  %v1261_v14 = vld [vmem:[#allocation9 + $0x468] sm:$0xff] }
 0x334   :  { %v5154_v32 = vpack.c.bf16 %v1112_v29, %v1112_v29  ;;  %v5156_v33 = vpack.c.bf16 %v1114_v30, %v1114_v30  ;;  %v4175_v17 = vcombine.high %v1129_v9, %v1133_v10  ;;  %v4303_v18 = vcombine.high %v1257_v12, %v1261_v14  ;;  %v1121_v2 = vld [vmem:[#allocation9 + $0x8] sm:$0xff] }
 0x335   :  { %2688 = vmatprep.mubr.bf16.mxu0 %v5150_v27  ;;  %2729 = vmatprep.mubr.bf16.mxu1 %v5152_v28  ;;  %v1125_v1 = vld [vmem:[#allocation9 + $0x28] sm:$0xff]  ;;  %v4174_v60 = vcombine.low %v1129_v9, %v1133_v10  ;;  %v4302_v22 = vcombine.low %v1257_v12, %v1261_v14 }
 0x336   :  { %2689 = vmatmul.mubr.bf16.vlgmr.msra.gmra.mxu0 %v5154_v32  ;;  %2730 = vmatmul.mubr.bf16.vlgmr.msra.gmra.mxu1 %v5156_v33  ;;  %v1253_v59 = vld [vmem:[#allocation9 + $0x428] sm:$0xff]  ;;  %v4167_v23 = vcombine.high %v1121_v2, %v1125_v1  ;;  %v4166_v35 = vcombine.low %v1121_v2, %v1125_v1 }
 0x337   :  { %2739 = vmatpush1.bf16.msra.mxu0 %v4222_v56  ;;  %2780 = vmatpush1.bf16.msra.mxu1 %v4350_v57  ;;  %v1145_v56 = vld [vmem:[#allocation9 + $0xc8] sm:$0xff]  ;;  %v4295_v24 = vcombine.high %v1249_v21, %v1253_v59 }
 0x338   :  { %2770 = vmatprep.mubr.bf16.mxu0 %v5150_v27  ;;  %2811 = vmatprep.mubr.bf16.mxu1 %v5152_v28  ;;  %v1149_v57 = vld [vmem:[#allocation9 + $0xe8] sm:$0xff] }
 0x339   :  { %2740 = vmatprep.subr.bf16.mxu0 %v4215_v36  ;;  %2781 = vmatprep.subr.bf16.mxu1 %v4343_v37  ;;  %v4191_v63 = vcombine.high %v1145_v56, %v1149_v57  ;;  %v4190_v7 = vcombine.low %v1145_v56, %v1149_v57  ;;  %v1369_v29 = vld [vmem:[#allocation9 + $0x7c8] sm:$0xff]  ;;  %v4294_v36 = vcombine.low %v1249_v21, %v1253_v59 }
 0x33a   :  { %v1373_v30 = vld [vmem:[#allocation9 + $0x7e8] sm:$0xff]  ;;  %v4287_v37 = vcombine.high %v1241_v25, %v1245_v26 }
 0x33b   :  { %2741 = vmatpush1.bf16.msra.mxu0 %v4214_v41  ;;  %2782 = vmatpush1.bf16.msra.mxu1 %v4342_v44  ;;  %v4415_v38 = vcombine.high %v1369_v29, %v1373_v30  ;;  %v1361_v41 = vld [vmem:[#allocation9 + $0x788] sm:$0xff] }
 0x33c   :  { %2742 = vmatprep.subr.bf16.mxu0 %v4207_v31  ;;  %2783 = vmatprep.subr.bf16.mxu1 %v4335_v34  ;;  %v1365_v44 = vld [vmem:[#allocation9 + $0x7a8] sm:$0xff]  ;;  %v4286_v31 = vcombine.low %v1241_v25, %v1245_v26  ;;  %v4414_v34 = vcombine.low %v1369_v29, %v1373_v30 }
 0x33d   :  { %v4407_v46 = vcombine.high %v1361_v41, %v1365_v44  ;;  %v1229_v48 = vld [vmem:[#allocation9 + $0x368] sm:$0xff] }
 0x33e   :  { %v4271_v56 = vcombine.high %v1225_v47, %v1229_v48  ;;  %v1217_v49 = vld [vmem:[#allocation9 + $0x308] sm:$0xff] }
 0x33f   :  { %2743 = vmatpush1.bf16.msra.mxu0 %v4206_v51  ;;  %2784 = vmatpush1.bf16.msra.mxu1 %v4334_v52  ;;  %v1353_v51 = vld [vmem:[#allocation9 + $0x748] sm:$0xff] }
 0x340   :  { %2744 = vmatprep.subr.bf16.mxu0 %v4199_v53  ;;  %2785 = vmatprep.subr.bf16.mxu1 %v4327_v55  ;;  %v1357_v52 = vld [vmem:[#allocation9 + $0x768] sm:$0xff]  ;;  %v4278_v53 = vcombine.low %v1233_v39, %v1237_v40  ;;  %v4406_v55 = vcombine.low %v1361_v41, %v1365_v44  ;;  %v1178_v41 = vld [vmem:[#allocation9 + $0x1d0] sm:$0xff] }
 0x341   :  { %v4399_v57 = vcombine.high %v1353_v51, %v1357_v52  ;;  %v1221_v50 = vld [vmem:[#allocation9 + $0x328] sm:$0xff]  ;;  %v1182_v44 = vld [vmem:[#allocation9 + $0x1f0] sm:$0xff] }
 0x342   :  { %v4263_v3 = vcombine.high %v1217_v49, %v1221_v50  ;;  %v1209_v5 = vld [vmem:[#allocation9 + $0x2c8] sm:$0xff] }
 0x343   :  { %2745 = vmatpush1.bf16.msra.mxu0 %v4198_v58  ;;  %2786 = vmatpush1.bf16.msra.mxu1 %v4326_v62  ;;  %v1345_v58 = vld [vmem:[#allocation9 + $0x708] sm:$0xff] }
 0x344   :  { %2746 = vmatprep.subr.bf16.mxu0 %v4191_v63  ;;  %2787 = vmatprep.subr.bf16.mxu1 %v4319_v0  ;;  %v1349_v62 = vld [vmem:[#allocation9 + $0x728] sm:$0xff]  ;;  %v4270_v63 = vcombine.low %v1225_v47, %v1229_v48  ;;  %v4398_v0 = vcombine.low %v1353_v51, %v1357_v52  ;;  %v4225_v47 = vcombine.high %v1178_v41, %v1182_v44  ;;  %v1170_v51 = vld [vmem:[#allocation9 + $0x190] sm:$0xff] }
 0x345   :  { %v4391_v4 = vcombine.high %v1345_v58, %v1349_v62  ;;  %v1213_v6 = vld [vmem:[#allocation9 + $0x2e8] sm:$0xff]  ;;  %v1174_v52 = vld [vmem:[#allocation9 + $0x1b0] sm:$0xff] }
 0x346   :  { %v4255_v9 = vcombine.high %v1209_v5, %v1213_v6  ;;  %v1201_v12 = vld [vmem:[#allocation9 + $0x288] sm:$0xff] }
 0x347   :  { %2747 = vmatpush1.bf16.msra.mxu0 %v4190_v7  ;;  %2788 = vmatpush1.bf16.msra.mxu1 %v4318_v8  ;;  %v1337_v7 = vld [vmem:[#allocation9 + $0x6c8] sm:$0xff] }
 0x348   :  { %2748 = vmatprep.subr.bf16.mxu0 %v4183_v54  ;;  %2789 = vmatprep.subr.bf16.mxu1 %v4311_v61  ;;  %v1341_v8 = vld [vmem:[#allocation9 + $0x6e8] sm:$0xff]  ;;  %v4262_v54 = vcombine.low %v1217_v49, %v1221_v50  ;;  %v4390_v61 = vcombine.low %v1345_v58, %v1349_v62  ;;  %v4217_v49 = vcombine.high %v1170_v51, %v1174_v52  ;;  %v1162_v58 = vld [vmem:[#allocation9 + $0x150] sm:$0xff] }
 0x349   :  { %v4383_v10 = vcombine.high %v1337_v7, %v1341_v8  ;;  %v1205_v14 = vld [vmem:[#allocation9 + $0x2a8] sm:$0xff]  ;;  %v1166_v62 = vld [vmem:[#allocation9 + $0x170] sm:$0xff] }
 0x34a   :  { %v4247_v2 = vcombine.high %v1201_v12, %v1205_v14  ;;  %v1193_v21 = vld [vmem:[#allocation9 + $0x248] sm:$0xff] }
 0x34b   :  { %2749 = vmatpush1.bf16.msra.mxu0 %v4182_v15  ;;  %2790 = vmatpush1.bf16.msra.mxu1 %v4310_v16  ;;  %v1329_v15 = vld [vmem:[#allocation9 + $0x688] sm:$0xff] }
 0x34c   :  { %2750 = vmatprep.subr.bf16.mxu0 %v4175_v17  ;;  %2791 = vmatprep.subr.bf16.mxu1 %v4303_v18  ;;  %v1333_v16 = vld [vmem:[#allocation9 + $0x6a8] sm:$0xff]  ;;  %v4254_v17 = vcombine.low %v1209_v5, %v1213_v6  ;;  %v4382_v18 = vcombine.low %v1337_v7, %v1341_v8  ;;  %v4209_v5 = vcombine.high %v1162_v58, %v1166_v62  ;;  %v1154_v7 = vld [vmem:[#allocation9 + $0x110] sm:$0xff] }
 0x34d   :  { %v4375_v1 = vcombine.high %v1329_v15, %v1333_v16  ;;  %v1197_v59 = vld [vmem:[#allocation9 + $0x268] sm:$0xff]  ;;  %v1158_v8 = vld [vmem:[#allocation9 + $0x130] sm:$0xff] }
 0x34e   :  { %v4239_v25 = vcombine.high %v1193_v21, %v1197_v59  ;;  %v1185_v29 = vld [vmem:[#allocation9 + $0x208] sm:$0xff] }
 0x34f   :  { %2751 = vmatpush1.bf16.msra.mxu0 %v4174_v60  ;;  %2792 = vmatpush1.bf16.msra.mxu1 %v4302_v22  ;;  %v1321_v60 = vld [vmem:[#allocation9 + $0x648] sm:$0xff] }
 0x350   :  { %2752 = vmatprep.subr.bf16.mxu0 %v4167_v23  ;;  %2793 = vmatprep.subr.bf16.mxu1 %v4295_v24  ;;  %v1325_v22 = vld [vmem:[#allocation9 + $0x668] sm:$0xff]  ;;  %v4246_v23 = vcombine.low %v1201_v12, %v1205_v14  ;;  %v4374_v24 = vcombine.low %v1329_v15, %v1333_v16  ;;  %v4201_v12 = vcombine.high %v1154_v7, %v1158_v8  ;;  %v1146_v15 = vld [vmem:[#allocation9 + $0xd0] sm:$0xff] }
 0x351   :  { %v4367_v26 = vcombine.high %v1321_v60, %v1325_v22  ;;  %v1189_v30 = vld [vmem:[#allocation9 + $0x228] sm:$0xff]  ;;  %v1150_v16 = vld [vmem:[#allocation9 + $0xf0] sm:$0xff] }
 0x352   :  { %v4231_v39 = vcombine.high %v1185_v29, %v1189_v30 }
 0x353   :  { %2753 = vmatpush1.bf16.msra.mxu0 %v4166_v35  ;;  %2794 = vmatpush1.bf16.msra.mxu1 %v4294_v36  ;;  %v1313_v35 = vld [vmem:[#allocation9 + $0x608] sm:$0xff] }
 0x354   :  { %2754 = vmatprep.subr.bf16.mxu0 %v4287_v37  ;;  %2795 = vmatprep.subr.bf16.mxu1 %v4415_v38  ;;  %v1317_v36 = vld [vmem:[#allocation9 + $0x628] sm:$0xff]  ;;  %v4238_v37 = vcombine.low %v1193_v21, %v1197_v59  ;;  %v4366_v38 = vcombine.low %v1321_v60, %v1325_v22  ;;  %v4193_v21 = vcombine.high %v1146_v15, %v1150_v16  ;;  %v1138_v60 = vld [vmem:[#allocation9 + $0x90] sm:$0xff] }
 0x355   :  { %v4359_v40 = vcombine.high %v1313_v35, %v1317_v36  ;;  %v1142_v22 = vld [vmem:[#allocation9 + $0xb0] sm:$0xff] }
 0x357   :  { %2755 = vmatpush2.bf16.msra.mxu0 %v4286_v31  ;;  %2796 = vmatpush2.bf16.msra.mxu1 %v4414_v34  ;;  %v1306_v31 = vld [vmem:[#allocation9 + $0x5d0] sm:$0xff] }
 0x358   :  { %2756 = vmatprep.subr.bf16.mxu0 %v4279_v45  ;;  %2797 = vmatprep.subr.bf16.mxu1 %v4407_v46  ;;  %v1310_v34 = vld [vmem:[#allocation9 + $0x5f0] sm:$0xff]  ;;  %v4230_v45 = vcombine.low %v1185_v29, %v1189_v30  ;;  %v4358_v46 = vcombine.low %v1313_v35, %v1317_v36  ;;  %v4185_v29 = vcombine.high %v1138_v60, %v1142_v22 }
 0x359   :  { %v4353_v48 = vcombine.high %v1306_v31, %v1310_v34  ;;  %v1130_v35 = vld [vmem:[#allocation9 + $0x50] sm:$0xff] }
 0x35a   :  { %v1134_v36 = vld [vmem:[#allocation9 + $0x70] sm:$0xff] }
 0x35b   :  { %2757 = vmatpush2.bf16.msra.mxu0 %v4278_v53  ;;  %2798 = vmatpush2.bf16.msra.mxu1 %v4406_v55  ;;  %v1298_v53 = vld [vmem:[#allocation9 + $0x590] sm:$0xff] }
 0x35c   :  { %2758 = vmatprep.subr.bf16.mxu0 %v4271_v56  ;;  %2799 = vmatprep.subr.bf16.mxu1 %v4399_v57  ;;  %v1302_v55 = vld [vmem:[#allocation9 + $0x5b0] sm:$0xff]  ;;  %v4224_v56 = vcombine.low %v1178_v41, %v1182_v44  ;;  %v4352_v57 = vcombine.low %v1306_v31, %v1310_v34  ;;  %v4177_v41 = vcombine.high %v1130_v35, %v1134_v36 }
 0x35d   :  { %v4345_v50 = vcombine.high %v1298_v53, %v1302_v55  ;;  %v1122_v31 = vld [vmem:[#allocation9 + $0x10] sm:$0xff] }
 0x35e   :  { %v1126_v34 = vld [vmem:[#allocation9 + $0x30] sm:$0xff] }
 0x35f   :  { %2759 = vmatpush2.bf16.msra.mxu0 %v4270_v63  ;;  %2800 = vmatpush2.bf16.msra.mxu1 %v4398_v0  ;;  %v1290_v63 = vld [vmem:[#allocation9 + $0x550] sm:$0xff] }
 0x360   :  { %2760 = vmatprep.subr.bf16.mxu0 %v4263_v3  ;;  %2801 = vmatprep.subr.bf16.mxu1 %v4391_v4  ;;  %v1294_v0 = vld [vmem:[#allocation9 + $0x570] sm:$0xff]  ;;  %v4216_v3 = vcombine.low %v1170_v51, %v1174_v52  ;;  %v4344_v4 = vcombine.low %v1298_v53, %v1302_v55  ;;  %v4169_v51 = vcombine.high %v1122_v31, %v1126_v34 }
 0x361   :  { %v4337_v6 = vcombine.high %v1290_v63, %v1294_v0  ;;  %v1242_v53 = vld [vmem:[#allocation9 + $0x3d0] sm:$0xff] }
 0x362   :  { %v1246_v55 = vld [vmem:[#allocation9 + $0x3f0] sm:$0xff] }
 0x363   :  { %2761 = vmatpush2.bf16.msra.mxu0 %v4262_v54  ;;  %2802 = vmatpush2.bf16.msra.mxu1 %v4390_v61  ;;  %v1282_v54 = vld [vmem:[#allocation9 + $0x510] sm:$0xff] }
 0x364   :  { %2762 = vmatprep.subr.bf16.mxu0 %v4255_v9  ;;  %2803 = vmatprep.subr.bf16.mxu1 %v4383_v10  ;;  %v1286_v61 = vld [vmem:[#allocation9 + $0x530] sm:$0xff]  ;;  %v4208_v9 = vcombine.low %v1162_v58, %v1166_v62  ;;  %v4336_v10 = vcombine.low %v1290_v63, %v1294_v0  ;;  %v4289_v58 = vcombine.high %v1242_v53, %v1246_v55 }
 0x365   :  { %v4329_v14 = vcombine.high %v1282_v54, %v1286_v61  ;;  %v1234_v63 = vld [vmem:[#allocation9 + $0x390] sm:$0xff] }
 0x366   :  { %v1238_v0 = vld [vmem:[#allocation9 + $0x3b0] sm:$0xff] }
 0x367   :  { %2763 = vmatpush2.bf16.msra.mxu0 %v4254_v17  ;;  %2804 = vmatpush2.bf16.msra.mxu1 %v4382_v18  ;;  %v1274_v17 = vld [vmem:[#allocation9 + $0x4d0] sm:$0xff] }
 0x368   :  { %2764 = vmatprep.subr.bf16.mxu0 %v4247_v2  ;;  %2805 = vmatprep.subr.bf16.mxu1 %v4375_v1  ;;  %v1278_v18 = vld [vmem:[#allocation9 + $0x4f0] sm:$0xff]  ;;  %v4200_v2 = vcombine.low %v1154_v7, %v1158_v8  ;;  %v4328_v1 = vcombine.low %v1282_v54, %v1286_v61  ;;  %v4281_v7 = vcombine.high %v1234_v63, %v1238_v0 }
 0x369   :  { %v4321_v59 = vcombine.high %v1274_v17, %v1278_v18  ;;  %v1226_v54 = vld [vmem:[#allocation9 + $0x350] sm:$0xff] }
 0x36a   :  { %v1230_v61 = vld [vmem:[#allocation9 + $0x370] sm:$0xff] }
 0x36b   :  { %2765 = vmatpush2.bf16.msra.mxu0 %v4246_v23  ;;  %2806 = vmatpush2.bf16.msra.mxu1 %v4374_v24  ;;  %v1266_v23 = vld [vmem:[#allocation9 + $0x490] sm:$0xff] }
 0x36c   :  { %2766 = vmatprep.subr.bf16.mxu0 %v4239_v25  ;;  %2807 = vmatprep.subr.bf16.mxu1 %v4367_v26  ;;  %v1270_v24 = vld [vmem:[#allocation9 + $0x4b0] sm:$0xff]  ;;  %v4192_v25 = vcombine.low %v1146_v15, %v1150_v16  ;;  %v4320_v26 = vcombine.low %v1274_v17, %v1278_v18  ;;  %v4273_v15 = vcombine.high %v1226_v54, %v1230_v61 }
 0x36d   :  { %v4313_v30 = vcombine.high %v1266_v23, %v1270_v24  ;;  %v1218_v17 = vld [vmem:[#allocation9 + $0x310] sm:$0xff] }
 0x36e   :  { %v1222_v18 = vld [vmem:[#allocation9 + $0x330] sm:$0xff] }
 0x36f   :  { %2767 = vmatpush2.bf16.msra.mxu0 %v4238_v37  ;;  %2808 = vmatpush2.bf16.msra.mxu1 %v4366_v38  ;;  %v1258_v37 = vld [vmem:[#allocation9 + $0x450] sm:$0xff] }
 0x370   :  { %2768 = vmatprep.subr.bf16.mxu0 %v4231_v39  ;;  %2809 = vmatprep.subr.bf16.mxu1 %v4359_v40  ;;  %v1262_v38 = vld [vmem:[#allocation9 + $0x470] sm:$0xff]  ;;  %v4184_v39 = vcombine.low %v1138_v60, %v1142_v22  ;;  %v4312_v40 = vcombine.low %v1266_v23, %v1270_v24  ;;  %v4265_v60 = vcombine.high %v1218_v17, %v1222_v18 }
 0x371   :  { %v4305_v44 = vcombine.high %v1258_v37, %v1262_v38  ;;  %v1210_v23 = vld [vmem:[#allocation9 + $0x2d0] sm:$0xff] }
 0x372   :  { %v1214_v24 = vld [vmem:[#allocation9 + $0x2f0] sm:$0xff] }
 0x373   :  { %2769 = vmatpush2.bf16.msra.mxu0 %v4230_v45  ;;  %2810 = vmatpush2.bf16.msra.mxu1 %v4358_v46  ;;  %v1250_v45 = vld [vmem:[#allocation9 + $0x410] sm:$0xff] }
 0x374   :  { %2820 = vmatprep.subr.bf16.mxu0 %v4225_v47  ;;  %2861 = vmatprep.subr.bf16.mxu1 %v4353_v48  ;;  %v1254_v46 = vld [vmem:[#allocation9 + $0x430] sm:$0xff]  ;;  %v4176_v47 = vcombine.low %v1130_v35, %v1134_v36  ;;  %v4304_v48 = vcombine.low %v1258_v37, %v1262_v38  ;;  %v4257_v35 = vcombine.high %v1210_v23, %v1214_v24 }
 0x375   :  { %v4297_v52 = vcombine.high %v1250_v45, %v1254_v46  ;;  %v1202_v37 = vld [vmem:[#allocation9 + $0x290] sm:$0xff] }
 0x376   :  { %2771 = vmatmul.mubr.bf16.vlgmr.msra.gmra.mxu0 %v5154_v32  ;;  %2812 = vmatmul.mubr.bf16.vlgmr.msra.gmra.mxu1 %v5156_v33  ;;  %v1206_v38 = vld [vmem:[#allocation9 + $0x2b0] sm:$0xff] }
 0x377   :  { %2821 = vmatpush1.bf16.msra.mxu0 %v4224_v56  ;;  %2852 = vmatprep.mubr.bf16.mxu0 %v5150_v27  ;;  %v1370_v56 = vld [vmem:[#allocation9 + $0x7d0] sm:$0xff] }
 0x378   :  { %2862 = vmatpush1.bf16.msra.mxu1 %v4352_v57  ;;  %2893 = vmatprep.mubr.bf16.mxu1 %v5152_v28  ;;  %v1374_v57 = vld [vmem:[#allocation9 + $0x7f0] sm:$0xff] }
 0x379   :  { %2822 = vmatprep.subr.bf16.mxu0 %v4217_v49  ;;  %2863 = vmatprep.subr.bf16.mxu1 %v4345_v50  ;;  %v4168_v49 = vcombine.low %v1122_v31, %v1126_v34  ;;  %v4296_v50 = vcombine.low %v1250_v45, %v1254_v46  ;;  %v4417_v62 = vcombine.high %v1370_v56, %v1374_v57  ;;  %v1194_v45 = vld [vmem:[#allocation9 + $0x250] sm:$0xff] }
 0x37a   :  { %v4249_v31 = vcombine.high %v1202_v37, %v1206_v38  ;;  %v1198_v46 = vld [vmem:[#allocation9 + $0x270] sm:$0xff] }
 0x37b   :  { %2823 = vmatpush1.bf16.msra.mxu0 %v4216_v3  ;;  %v1362_v3 = vld [vmem:[#allocation9 + $0x790] sm:$0xff] }
 0x37c   :  { %2864 = vmatpush1.bf16.msra.mxu1 %v4344_v4  ;;  %2824 = vmatprep.subr.bf16.mxu0 %v4209_v5  ;;  %v1366_v4 = vld [vmem:[#allocation9 + $0x7b0] sm:$0xff]  ;;  %v4288_v5 = vcombine.low %v1242_v53, %v1246_v55  ;;  %v4241_v53 = vcombine.high %v1194_v45, %v1198_v46 }
 0x37d   :  { %2865 = vmatprep.subr.bf16.mxu1 %v4337_v6  ;;  %v4416_v6 = vcombine.low %v1370_v56, %v1374_v57  ;;  %v4409_v8 = vcombine.high %v1362_v3, %v1366_v4  ;;  %v1186_v56 = vld [vmem:[#allocation9 + $0x210] sm:$0xff] }
 0x37e   :  { %v1190_v57 = vld [vmem:[#allocation9 + $0x230] sm:$0xff] }
 0x37f   :  { %2825 = vmatpush1.bf16.msra.mxu0 %v4208_v9  ;;  %v1354_v9 = vld [vmem:[#allocation9 + $0x750] sm:$0xff] }
 0x380   :  { %2866 = vmatpush1.bf16.msra.mxu1 %v4336_v10  ;;  %2826 = vmatprep.subr.bf16.mxu0 %v4201_v12  ;;  %v1358_v10 = vld [vmem:[#allocation9 + $0x770] sm:$0xff]  ;;  %v4280_v12 = vcombine.low %v1234_v63, %v1238_v0  ;;  %v4233_v63 = vcombine.high %v1186_v56, %v1190_v57 }
 0x381   :  { %2867 = vmatprep.subr.bf16.mxu1 %v4329_v14  ;;  %v4408_v14 = vcombine.low %v1362_v3, %v1366_v4  ;;  %v4401_v16 = vcombine.high %v1354_v9, %v1358_v10  ;;  %v1179_v3 = vld [vmem:[#allocation9 + $0x1d8] sm:$0xff] }
 0x382   :  { %v1183_v4 = vld [vmem:[#allocation9 + $0x1f8] sm:$0xff] }
 0x383   :  { %2827 = vmatpush1.bf16.msra.mxu0 %v4200_v2  ;;  %v1346_v2 = vld [vmem:[#allocation9 + $0x710] sm:$0xff] }
 0x384   :  { %2868 = vmatpush1.bf16.msra.mxu1 %v4328_v1  ;;  %2828 = vmatprep.subr.bf16.mxu0 %v4193_v21  ;;  %v1350_v1 = vld [vmem:[#allocation9 + $0x730] sm:$0xff]  ;;  %v4272_v21 = vcombine.low %v1226_v54, %v1230_v61  ;;  %v4227_v54 = vcombine.high %v1179_v3, %v1183_v4 }
 0x385   :  { %2869 = vmatprep.subr.bf16.mxu1 %v4321_v59  ;;  %v4400_v59 = vcombine.low %v1354_v9, %v1358_v10  ;;  %v4393_v22 = vcombine.high %v1346_v2, %v1350_v1  ;;  %v1171_v9 = vld [vmem:[#allocation9 + $0x198] sm:$0xff] }
 0x386   :  { %v1175_v10 = vld [vmem:[#allocation9 + $0x1b8] sm:$0xff] }
 0x387   :  { %2829 = vmatpush1.bf16.msra.mxu0 %v4192_v25  ;;  %v1338_v25 = vld [vmem:[#allocation9 + $0x6d0] sm:$0xff] }
 0x388   :  { %2870 = vmatpush1.bf16.msra.mxu1 %v4320_v26  ;;  %2830 = vmatprep.subr.bf16.mxu0 %v4185_v29  ;;  %v1342_v26 = vld [vmem:[#allocation9 + $0x6f0] sm:$0xff]  ;;  %v4264_v29 = vcombine.low %v1218_v17, %v1222_v18  ;;  %v4219_v17 = vcombine.high %v1171_v9, %v1175_v10  ;;  %v1163_v18 = vld [vmem:[#allocation9 + $0x158] sm:$0xff] }
 0x389   :  { %2871 = vmatprep.subr.bf16.mxu1 %v4313_v30  ;;  %v4392_v30 = vcombine.low %v1346_v2, %v1350_v1  ;;  %v4385_v36 = vcombine.high %v1338_v25, %v1342_v26  ;;  %v1167_v2 = vld [vmem:[#allocation9 + $0x178] sm:$0xff] }
 0x38b   :  { %2831 = vmatpush1.bf16.msra.mxu0 %v4184_v39  ;;  %v1330_v39 = vld [vmem:[#allocation9 + $0x690] sm:$0xff] }
 0x38c   :  { %2872 = vmatpush1.bf16.msra.mxu1 %v4312_v40  ;;  %2832 = vmatprep.subr.bf16.mxu0 %v4177_v41  ;;  %v1334_v40 = vld [vmem:[#allocation9 + $0x6b0] sm:$0xff]  ;;  %v4256_v41 = vcombine.low %v1210_v23, %v1214_v24  ;;  %v4211_v23 = vcombine.high %v1163_v18, %v1167_v2 }
 0x38d   :  { %2873 = vmatprep.subr.bf16.mxu1 %v4305_v44  ;;  %v4384_v44 = vcombine.low %v1338_v25, %v1342_v26  ;;  %v4377_v34 = vcombine.high %v1330_v39, %v1334_v40  ;;  %v1155_v25 = vld [vmem:[#allocation9 + $0x118] sm:$0xff] }
 0x38e   :  { %v1159_v26 = vld [vmem:[#allocation9 + $0x138] sm:$0xff] }
 0x38f   :  { %2833 = vmatpush1.bf16.msra.mxu0 %v4176_v47  ;;  %v1322_v47 = vld [vmem:[#allocation9 + $0x650] sm:$0xff] }
 0x390   :  { %2874 = vmatpush1.bf16.msra.mxu1 %v4304_v48  ;;  %2834 = vmatprep.subr.bf16.mxu0 %v4169_v51  ;;  %v1326_v48 = vld [vmem:[#allocation9 + $0x670] sm:$0xff]  ;;  %v4248_v51 = vcombine.low %v1202_v37, %v1206_v38  ;;  %v4203_v37 = vcombine.high %v1155_v25, %v1159_v26  ;;  %v1147_v38 = vld [vmem:[#allocation9 + $0xd8] sm:$0xff] }
 0x391   :  { %2875 = vmatprep.subr.bf16.mxu1 %v4297_v52  ;;  %v4376_v52 = vcombine.low %v1330_v39, %v1334_v40  ;;  %v4369_v55 = vcombine.high %v1322_v47, %v1326_v48  ;;  %v1151_v39 = vld [vmem:[#allocation9 + $0xf8] sm:$0xff] }
 0x392   :  { %v1275_v40 = vld [vmem:[#allocation9 + $0x4d8] sm:$0xff] }
 0x393   :  { %2835 = vmatpush1.bf16.msra.mxu0 %v4168_v49  ;;  %v1314_v49 = vld [vmem:[#allocation9 + $0x610] sm:$0xff] }
 0x394   :  { %2876 = vmatpush1.bf16.msra.mxu1 %v4296_v50  ;;  %2836 = vmatprep.subr.bf16.mxu0 %v4289_v58  ;;  %v1318_v50 = vld [vmem:[#allocation9 + $0x630] sm:$0xff]  ;;  %v4240_v58 = vcombine.low %v1194_v45, %v1198_v46  ;;  %v1139_v45 = vld [vmem:[#allocation9 + $0x98] sm:$0xff] }
 0x395   :  { %2877 = vmatprep.subr.bf16.mxu1 %v4417_v62  ;;  %v4368_v62 = vcombine.low %v1322_v47, %v1326_v48  ;;  %v4361_v0 = vcombine.high %v1314_v49, %v1318_v50  ;;  %v1143_v46 = vld [vmem:[#allocation9 + $0xb8] sm:$0xff] }
 0x396   :  { %v1267_v47 = vld [vmem:[#allocation9 + $0x498] sm:$0xff] }
 0x397   :  { %2837 = vmatpush2.bf16.msra.mxu0 %v4288_v5  ;;  %v1307_v5 = vld [vmem:[#allocation9 + $0x5d8] sm:$0xff] }
 0x398   :  { %2878 = vmatpush2.bf16.msra.mxu1 %v4416_v6  ;;  %2838 = vmatprep.subr.bf16.mxu0 %v4281_v7  ;;  %v1311_v6 = vld [vmem:[#allocation9 + $0x5f8] sm:$0xff]  ;;  %v4232_v7 = vcombine.low %v1186_v56, %v1190_v57 }
 0x399   :  { %2879 = vmatprep.subr.bf16.mxu1 %v4409_v8  ;;  %v4360_v8 = vcombine.low %v1314_v49, %v1318_v50  ;;  %v4355_v61 = vcombine.high %v1307_v5, %v1311_v6  ;;  %v1271_v48 = vld [vmem:[#allocation9 + $0x4b8] sm:$0xff] }
 0x39a   :  { %v1131_v56 = vld [vmem:[#allocation9 + $0x58] sm:$0xff] }
 0x39b   :  { %2839 = vmatpush2.bf16.msra.mxu0 %v4280_v12  ;;  %v4226_v12 = vcombine.low %v1179_v3, %v1183_v4  ;;  %v1135_v57 = vld [vmem:[#allocation9 + $0x78] sm:$0xff] }
 0x39c   :  { %2880 = vmatpush2.bf16.msra.mxu1 %v4408_v14  ;;  %2840 = vmatprep.subr.bf16.mxu0 %v4273_v15  ;;  %v1299_v14 = vld [vmem:[#allocation9 + $0x598] sm:$0xff] }
 0x39d   :  { %2881 = vmatprep.subr.bf16.mxu1 %v4401_v16  ;;  %v1303_v15 = vld [vmem:[#allocation9 + $0x5b8] sm:$0xff]  ;;  %v4354_v16 = vcombine.low %v1307_v5, %v1311_v6 }
 0x39e   :  { %v4347_v1 = vcombine.high %v1299_v14, %v1303_v15  ;;  %v1259_v49 = vld [vmem:[#allocation9 + $0x458] sm:$0xff] }
 0x39f   :  { %2841 = vmatpush2.bf16.msra.mxu0 %v4272_v21  ;;  %v1291_v21 = vld [vmem:[#allocation9 + $0x558] sm:$0xff] }
 0x3a0   :  { %2882 = vmatpush2.bf16.msra.mxu1 %v4400_v59  ;;  %2842 = vmatprep.subr.bf16.mxu0 %v4265_v60  ;;  %v1295_v59 = vld [vmem:[#allocation9 + $0x578] sm:$0xff]  ;;  %v4218_v60 = vcombine.low %v1171_v9, %v1175_v10 }
 0x3a1   :  { %2883 = vmatprep.subr.bf16.mxu1 %v4393_v22  ;;  %v4346_v22 = vcombine.low %v1299_v14, %v1303_v15  ;;  %v4339_v24 = vcombine.high %v1291_v21, %v1295_v59  ;;  %v1263_v50 = vld [vmem:[#allocation9 + $0x478] sm:$0xff] }
 0x3a2   :  { %v1123_v3 = vld [vmem:[#allocation9 + $0x18] sm:$0xff] }
 0x3a3   :  { %2843 = vmatpush2.bf16.msra.mxu0 %v4264_v29  ;;  %v1283_v29 = vld [vmem:[#allocation9 + $0x518] sm:$0xff] }
 0x3a4   :  { %2884 = vmatpush2.bf16.msra.mxu1 %v4392_v30  ;;  %2844 = vmatprep.subr.bf16.mxu0 %v4257_v35  ;;  %v1287_v30 = vld [vmem:[#allocation9 + $0x538] sm:$0xff]  ;;  %v4210_v35 = vcombine.low %v1163_v18, %v1167_v2 }
 0x3a5   :  { %2885 = vmatprep.subr.bf16.mxu1 %v4385_v36  ;;  %v4338_v36 = vcombine.low %v1291_v21, %v1295_v59  ;;  %v1127_v4 = vld [vmem:[#allocation9 + $0x38] sm:$0xff] }
 0x3a6   :  { %v1251_v5 = vld [vmem:[#allocation9 + $0x418] sm:$0xff]  ;;  %v4170_v15 = vcombine.low %v1123_v3, %v1127_v4 }
 0x3a7   :  { %2845 = vmatpush2.bf16.msra.mxu0 %v4256_v41  ;;  %v1279_v41 = vld [vmem:[#allocation9 + $0x4f8] sm:$0xff] }
 0x3a8   :  { %2886 = vmatpush2.bf16.msra.mxu1 %v4384_v44  ;;  %2846 = vmatprep.subr.bf16.mxu0 %v4249_v31  ;;  %v4330_v44 = vcombine.low %v1283_v29, %v1287_v30  ;;  %v4195_v31 = vcombine.high %v1147_v38, %v1151_v39  ;;  %v1255_v6 = vld [vmem:[#allocation9 + $0x438] sm:$0xff] }
 0x3a9   :  { %2887 = vmatprep.subr.bf16.mxu1 %v4377_v34  ;;  %v4323_v34 = vcombine.high %v1275_v40, %v1279_v41  ;;  %v1243_v9 = vld [vmem:[#allocation9 + $0x3d8] sm:$0xff] }
 0x3aa   :  { %v1247_v10 = vld [vmem:[#allocation9 + $0x3f8] sm:$0xff] }
 0x3ab   :  { %2847 = vmatpush2.bf16.msra.mxu0 %v4248_v51  ;;  %v4194_v51 = vcombine.low %v1147_v38, %v1151_v39  ;;  %v1375_v14 = vld [vmem:[#allocation9 + $0x7f8] sm:$0xff] }
 0x3ac   :  { %2888 = vmatpush2.bf16.msra.mxu1 %v4376_v52  ;;  %2848 = vmatprep.subr.bf16.mxu0 %v4241_v53  ;;  %v4322_v52 = vcombine.low %v1275_v40, %v1279_v41  ;;  %v4187_v53 = vcombine.high %v1139_v45, %v1143_v46  ;;  %v1235_v2 = vld [vmem:[#allocation9 + $0x398] sm:$0xff] }
 0x3ad   :  { %2889 = vmatprep.subr.bf16.mxu1 %v4369_v55  ;;  %v4315_v55 = vcombine.high %v1267_v47, %v1271_v48  ;;  %v1363_v21 = vld [vmem:[#allocation9 + $0x798] sm:$0xff] }
 0x3ae   :  { %v1367_v59 = vld [vmem:[#allocation9 + $0x7b8] sm:$0xff] }
 0x3af   :  { %2849 = vmatpush2.bf16.msra.mxu0 %v4240_v58  ;;  %v4186_v58 = vcombine.low %v1139_v45, %v1143_v46  ;;  %v1219_v38 = vld [vmem:[#allocation9 + $0x318] sm:$0xff] }
 0x3b0   :  { %2890 = vmatpush2.bf16.msra.mxu1 %v4368_v62  ;;  %2850 = vmatprep.subr.bf16.mxu0 %v4233_v63  ;;  %v4314_v62 = vcombine.low %v1267_v47, %v1271_v48  ;;  %v4179_v63 = vcombine.high %v1131_v56, %v1135_v57  ;;  %v1223_v39 = vld [vmem:[#allocation9 + $0x338] sm:$0xff] }
 0x3b1   :  { %2891 = vmatprep.subr.bf16.mxu1 %v4361_v0  ;;  %v4307_v0 = vcombine.high %v1259_v49, %v1263_v50  ;;  %v1347_v40 = vld [vmem:[#allocation9 + $0x718] sm:$0xff] }
 0x3b2   :  { %v1351_v41 = vld [vmem:[#allocation9 + $0x738] sm:$0xff] }
 0x3b3   :  { %2851 = vmatpush2.bf16.msra.mxu0 %v4232_v7  ;;  %v4178_v7 = vcombine.low %v1131_v56, %v1135_v57  ;;  %v1211_v45 = vld [vmem:[#allocation9 + $0x2d8] sm:$0xff] }
 0x3b4   :  { %2892 = vmatpush2.bf16.msra.mxu1 %v4360_v8  ;;  %2902 = vmatprep.subr.bf16.mxu0 %v4227_v54  ;;  %v4306_v8 = vcombine.low %v1259_v49, %v1263_v50  ;;  %v4171_v54 = vcombine.high %v1123_v3, %v1127_v4  ;;  %v1215_v46 = vld [vmem:[#allocation9 + $0x2f8] sm:$0xff] }
 0x3b5   :  { %2943 = vmatprep.subr.bf16.mxu1 %v4355_v61  ;;  %v4299_v61 = vcombine.high %v1251_v5, %v1255_v6  ;;  %v1339_v47 = vld [vmem:[#allocation9 + $0x6d8] sm:$0xff] }
 0x3b6   :  { %2853 = vmatmul.mubr.bf16.vlgmr.msra.gmra.mxu0 %v5154_v32  ;;  %v1343_v48 = vld [vmem:[#allocation9 + $0x6f8] sm:$0xff] }
 0x3b7   :  { %2894 = vmatmul.mubr.bf16.vlgmr.msra.gmra.mxu1 %v5156_v33  ;;  %2903 = vmatpush1.bf16.msra.mxu0 %v4226_v12  ;;  %v1371_v12 = vld [vmem:[#allocation9 + $0x7d8] sm:$0xff] }
 0x3b8   :  { %2934 = vmatprep.mubr.bf16.mxu0 %v5150_v27  ;;  %2944 = vmatpush1.bf16.msra.mxu1 %v4354_v16  ;;  %v4331_v27 = vcombine.high %v1283_v29, %v1287_v30  ;;  %v4298_v16 = vcombine.low %v1251_v5, %v1255_v6  ;;  %v4419_v18 = vcombine.high %v1371_v12, %v1375_v14  ;;  %v1355_v29 = vld [vmem:[#allocation9 + $0x758] sm:$0xff] }
 0x3b9   :  { %2975 = vmatprep.mubr.bf16.mxu1 %v5152_v28  ;;  %2904 = vmatprep.subr.bf16.mxu0 %v4219_v17  ;;  %v4202_v28 = vcombine.low %v1155_v25, %v1159_v26  ;;  %v4291_v17 = vcombine.high %v1243_v9, %v1247_v10  ;;  %v1227_v25 = vld [vmem:[#allocation9 + $0x358] sm:$0xff] }
 0x3ba   :  { %2945 = vmatprep.subr.bf16.mxu1 %v4347_v1  ;;  %v1239_v1 = vld [vmem:[#allocation9 + $0x3b8] sm:$0xff] }
 0x3bb   :  { %2905 = vmatpush1.bf16.msra.mxu0 %v4218_v60  ;;  %v4290_v60 = vcombine.low %v1243_v9, %v1247_v10  ;;  %v1231_v26 = vld [vmem:[#allocation9 + $0x378] sm:$0xff] }
 0x3bc   :  { %2946 = vmatpush1.bf16.msra.mxu1 %v4346_v22  ;;  %2906 = vmatprep.subr.bf16.mxu0 %v4211_v23  ;;  %v4418_v22 = vcombine.low %v1371_v12, %v1375_v14  ;;  %v4283_v23 = vcombine.high %v1235_v2, %v1239_v1  ;;  %v1359_v30 = vld [vmem:[#allocation9 + $0x778] sm:$0xff] }
 0x3bd   :  { %2947 = vmatprep.subr.bf16.mxu1 %v4339_v24  ;;  %v4411_v24 = vcombine.high %v1363_v21, %v1367_v59  ;;  %v1203_v56 = vld [vmem:[#allocation9 + $0x298] sm:$0xff] }
 0x3be   :  { %v1207_v57 = vld [vmem:[#allocation9 + $0x2b8] sm:$0xff] }
 0x3bf   :  { %2907 = vmatpush1.bf16.msra.mxu0 %v4210_v35  ;;  %v4282_v35 = vcombine.low %v1235_v2, %v1239_v1  ;;  %v1331_v49 = vld [vmem:[#allocation9 + $0x698] sm:$0xff] }
 0x3c0   :  { %2948 = vmatpush1.bf16.msra.mxu1 %v4338_v36  ;;  %2908 = vmatprep.subr.bf16.mxu0 %v4203_v37  ;;  %v4410_v36 = vcombine.low %v1363_v21, %v1367_v59  ;;  %v4275_v37 = vcombine.high %v1227_v25, %v1231_v26  ;;  %v1335_v50 = vld [vmem:[#allocation9 + $0x6b8] sm:$0xff] }
 0x3c1   :  { %2949 = vmatprep.subr.bf16.mxu1 %v4331_v27  ;;  %v4403_v27 = vcombine.high %v1355_v29, %v1359_v30  ;;  %v1195_v3 = vld [vmem:[#allocation9 + $0x258] sm:$0xff] }
 0x3c2   :  { %v1199_v4 = vld [vmem:[#allocation9 + $0x278] sm:$0xff] }
 0x3c3   :  { %2909 = vmatpush1.bf16.msra.mxu0 %v4202_v28  ;;  %v4274_v28 = vcombine.low %v1227_v25, %v1231_v26  ;;  %v1323_v5 = vld [vmem:[#allocation9 + $0x658] sm:$0xff] }
 0x3c4   :  { %2950 = vmatpush1.bf16.msra.mxu1 %v4330_v44  ;;  %2910 = vmatprep.subr.bf16.mxu0 %v4195_v31  ;;  %v4402_v44 = vcombine.low %v1355_v29, %v1359_v30  ;;  %v4267_v31 = vcombine.high %v1219_v38, %v1223_v39  ;;  %v1327_v6 = vld [vmem:[#allocation9 + $0x678] sm:$0xff] }
 0x3c5   :  { %2951 = vmatprep.subr.bf16.mxu1 %v4323_v34  ;;  %v4395_v34 = vcombine.high %v1347_v40, %v1351_v41  ;;  %v1187_v9 = vld [vmem:[#allocation9 + $0x218] sm:$0xff] }
 0x3c6   :  { %v1191_v10 = vld [vmem:[#allocation9 + $0x238] sm:$0xff] }
 0x3c7   :  { %2911 = vmatpush1.bf16.msra.mxu0 %v4194_v51  ;;  %v4266_v51 = vcombine.low %v1219_v38, %v1223_v39  ;;  %v1315_v12 = vld [vmem:[#allocation9 + $0x618] sm:$0xff]  ;;  %v4234_v2 = vcombine.low %v1187_v9, %v1191_v10 }
 0x3c8   :  { %2952 = vmatpush1.bf16.msra.mxu1 %v4322_v52  ;;  %2912 = vmatprep.subr.bf16.mxu0 %v4187_v53  ;;  %v4394_v52 = vcombine.low %v1347_v40, %v1351_v41  ;;  %v4259_v53 = vcombine.high %v1211_v45, %v1215_v46  ;;  %v1319_v14 = vld [vmem:[#allocation9 + $0x638] sm:$0xff] }
 0x3c9   :  { %2953 = vmatprep.subr.bf16.mxu1 %v4315_v55  ;;  %v4387_v55 = vcombine.high %v1339_v47, %v1343_v48  ;;  %v4362_v1 = vcombine.low %v1315_v12, %v1319_v14 }
 0x3cb   :  { %2913 = vmatpush1.bf16.msra.mxu0 %v4186_v58  ;;  %v4258_v58 = vcombine.low %v1211_v45, %v1215_v46 }
 0x3cc   :  { %2954 = vmatpush1.bf16.msra.mxu1 %v4314_v62  ;;  %2914 = vmatprep.subr.bf16.mxu0 %v4179_v63  ;;  %v4386_v62 = vcombine.low %v1339_v47, %v1343_v48  ;;  %v4251_v63 = vcombine.high %v1203_v56, %v1207_v57 }
 0x3cd   :  { %2955 = vmatprep.subr.bf16.mxu1 %v4307_v0  ;;  %v4379_v0 = vcombine.high %v1331_v49, %v1335_v50 }
 0x3cf   :  { %2915 = vmatpush1.bf16.msra.mxu0 %v4178_v7  ;;  %v4250_v7 = vcombine.low %v1203_v56, %v1207_v57 }
 0x3d0   :  { %2956 = vmatpush1.bf16.msra.mxu1 %v4306_v8  ;;  %2916 = vmatprep.subr.bf16.mxu0 %v4171_v54  ;;  %v4378_v8 = vcombine.low %v1331_v49, %v1335_v50  ;;  %v4243_v54 = vcombine.high %v1195_v3, %v1199_v4 }
 0x3d1   :  { %2957 = vmatprep.subr.bf16.mxu1 %v4299_v61  ;;  %v4371_v61 = vcombine.high %v1323_v5, %v1327_v6 }
 0x3d3   :  { %2917 = vmatpush1.bf16.msra.mxu0 %v4170_v15  ;;  %v4242_v15 = vcombine.low %v1195_v3, %v1199_v4 }
 0x3d4   :  { %2958 = vmatpush1.bf16.msra.mxu1 %v4298_v16  ;;  %2918 = vmatprep.subr.bf16.mxu0 %v4291_v17  ;;  %v4370_v16 = vcombine.low %v1323_v5, %v1327_v6  ;;  %v4235_v17 = vcombine.high %v1187_v9, %v1191_v10 }
 0x3d5   :  { %2959 = vmatprep.subr.bf16.mxu1 %v4419_v18  ;;  %v4363_v18 = vcombine.high %v1315_v12, %v1319_v14 }
 0x3d7   :  { %2919 = vmatpush2.bf16.msra.mxu0 %v4290_v60 }
 0x3d8   :  { %2960 = vmatpush2.bf16.msra.mxu1 %v4418_v22  ;;  %2920 = vmatprep.subr.bf16.mxu0 %v4283_v23 }
 0x3d9   :  { %2961 = vmatprep.subr.bf16.mxu1 %v4411_v24 }
 0x3db   :  { %2921 = vmatpush2.bf16.msra.mxu0 %v4282_v35 }
 0x3dc   :  { %2962 = vmatpush2.bf16.msra.mxu1 %v4410_v36  ;;  %2922 = vmatprep.subr.bf16.mxu0 %v4275_v37 }
 0x3dd   :  { %2963 = vmatprep.subr.bf16.mxu1 %v4403_v27 }
 0x3df   :  { %2923 = vmatpush2.bf16.msra.mxu0 %v4274_v28 }
 0x3e0   :  { %2964 = vmatpush2.bf16.msra.mxu1 %v4402_v44  ;;  %2924 = vmatprep.subr.bf16.mxu0 %v4267_v31 }
 0x3e1   :  { %2965 = vmatprep.subr.bf16.mxu1 %v4395_v34 }
 0x3e3   :  { %2925 = vmatpush2.bf16.msra.mxu0 %v4266_v51 }
 0x3e4   :  { %2966 = vmatpush2.bf16.msra.mxu1 %v4394_v52  ;;  %2926 = vmatprep.subr.bf16.mxu0 %v4259_v53 }
 0x3e5   :  { %2967 = vmatprep.subr.bf16.mxu1 %v4387_v55 }
 0x3e7   :  { %2927 = vmatpush2.bf16.msra.mxu0 %v4258_v58 }
 0x3e8   :  { %2968 = vmatpush2.bf16.msra.mxu1 %v4386_v62  ;;  %2928 = vmatprep.subr.bf16.mxu0 %v4251_v63 }
 0x3e9   :  { %2969 = vmatprep.subr.bf16.mxu1 %v4379_v0 }
 0x3eb   :  { %2929 = vmatpush2.bf16.msra.mxu0 %v4250_v7 }
 0x3ec   :  { %2970 = vmatpush2.bf16.msra.mxu1 %v4378_v8  ;;  %2930 = vmatprep.subr.bf16.mxu0 %v4243_v54 }
 0x3ed   :  { %2971 = vmatprep.subr.bf16.mxu1 %v4371_v61 }
 0x3ef   :  { %2931 = vmatpush2.bf16.msra.mxu0 %v4242_v15 }
 0x3f0   :  { %2972 = vmatpush2.bf16.msra.mxu1 %v4370_v16  ;;  %2932 = vmatprep.subr.bf16.mxu0 %v4235_v17 }
 0x3f1   :  { %2973 = vmatprep.subr.bf16.mxu1 %v4363_v18 }
 0x3f3   :  { %2933 = vmatpush2.bf16.msra.mxu0 %v4234_v2 }
 0x3f4   :  { %2974 = vmatpush2.bf16.msra.mxu1 %v4362_v1 }
 0x3f6   :  { %2935 = vmatmul.mubr.bf16.vlgmr.msra.gmra.mxu0 %v5154_v32  ;;  %v2690_v21 = vpop.f32.mrf.mxu0  ;;  %v2731_v59 = vpop.f32.mrf.mxu1 }
 0x3f7   :  { %2976 = vmatmul.mubr.bf16.vlgmr.msra.gmra.mxu1 %v5156_v33  ;;  %v5180_v60 = vadd.f32 %v2731_v59, %v2690_v21 }
 0x3f8   :  { %v2692_v22 = vpop.f32.mrf.mxu0  ;;  %v2733_v23 = vpop.f32.mrf.mxu1 }
 0x3f9   :  { %v2984_v24 = vrot.slane %v5180_v60, 4  ;;  %v3040_v25 = vmul.f32 %v5180_v60, %v5180_v60  ;;  %v5185_v26 = vadd.f32 %v2733_v23, %v2692_v22 }
 0x3fa   :  { %v2694_v29 = vpop.f32.mrf.mxu0  ;;  %v2735_v30 = vpop.f32.mrf.mxu1 }
 0x3fb   :  { %v2985_v35 = vadd.f32 %v2984_v24, %v5180_v60  ;;  %v3048_v32 = vrot.slane %v3040_v25, 4  ;;  %v2990_v36 = vrot.slane %v5185_v26, 4  ;;  %v3041_v33 = vmul.f32 %v5185_v26, %v5185_v26 }
 0x3fc   :  { %v2695_v37 = vpop.f32.mrf.mxu0  ;;  %v2736_v27 = vpop.f32.mrf.mxu1 }
 0x3fd   :  { %v2986_v38 = vrot.slane %v2985_v35, 2  ;;  %v3049_v39 = vadd.f32 %v3048_v32, %v3040_v25  ;;  %v2991_v40 = vadd.f32 %v2990_v36, %v5185_v26  ;;  %v3054_v41 = vrot.slane %v3041_v33, 4 }
 0x3ff   :  { %v2987_v28 = vadd.f32 %v2986_v38, %v2985_v35  ;;  %v3050_v44 = vrot.slane %v3049_v39, 2  ;;  %v2992_v31 = vrot.slane %v2991_v40, 2  ;;  %v3055_v34 = vadd.f32 %v3054_v41, %v3041_v33 }
 0x401   :  { %v2988_v45 = vrot.slane %v2987_v28, 1  ;;  %v3051_v46 = vadd.f32 %v3050_v44, %v3049_v39  ;;  %v2993_v47 = vadd.f32 %v2992_v31, %v2991_v40  ;;  %v3056_v48 = vrot.slane %v3055_v34, 2 }
 0x403   :  { %v2989_v51 = vadd.f32 %v2988_v45, %v2987_v28  ;;  %v3052_v52 = vrot.slane %v3051_v46, 1  ;;  %v2994_v53 = vrot.slane %v2993_v47, 1  ;;  %v3057_v55 = vadd.f32 %v3056_v48, %v3055_v34 }
 0x405   :  { %v5192_v56 = vmul.f32 0.125, %v2989_v51  ;;  %v3053_v57 = vadd.f32 %v3052_v52, %v3051_v46  ;;  %v2995_v49 = vadd.f32 %v2994_v53, %v2993_v47  ;;  %v3058_v50 = vrot.slane %v3057_v55, 1 }
 0x407   :  { %v3096_v58 = vmul.f32 0.125, %v3053_v57  ;;  %v3104_v62 = vmul.f32 %v5192_v56, %v5192_v56  ;;  %v5196_v63 = vmul.f32 0.125, %v2995_v49  ;;  %v3059_v0 = vadd.f32 %v3058_v50, %v3057_v55 }
 0x409   :  { %v3112_v3 = vsub.f32 %v3096_v58, %v3104_v62  ;;  %v3097_v4 = vmul.f32 0.125, %v3059_v0  ;;  %v3105_v5 = vmul.f32 %v5196_v63, %v5196_v63 }
 0x40b   :  { %v3120_v6 = vadd.f32 0.8, %v3112_v3  ;;  %v3113_v7 = vsub.f32 %v3097_v4, %v3105_v5 }
 0x40d   :  { %v3121_v8 = vadd.f32 0.8, %v3113_v7  ;;  %4801 = vrsqrt.f32 %v3120_v6 }
 0x40f   :  { %4803 = vrsqrt.f32 %v3121_v8 }
 0x41a   :  { %v4802_v54 = vpop.eup %4801 }
 0x41c   :  { %v4804_v61 = vpop.eup %4803 }
 0x41d   :  { %v3144_v9 = vcombine.low %v4802_v54, %v4804_v61  ;;  %v4725_v61 = vld [vmem:[#allocation10 + $0x78] sm:$0xff]  }
 0x41e   :  { %4488 = vmatprep.subr.bf16.mxu0 %v4725_v61 }
 0x41f   :  { %v5221_v7 = vrot.slane %v3144_v9, %v5068_v13  ;;  %v4733_v9 = vld [vmem:[#allocation10 + $0x68] sm:$0xff]  }
 0x436   :  { %v2772_v10 = vpop.f32.mrf.mxu0  ;;  %v2813_v12 = vpop.f32.mrf.mxu1 }
 0x437   :  { %v5200_v14 = vadd.f32 %v2813_v12, %v2772_v10  ;;  %v4726_v10 = vld [vmem:[#allocation10 + $0xf8] sm:$0xff]  }
 0x438   :  { %v2774_v15 = vpop.f32.mrf.mxu0  ;;  %v2815_v16 = vpop.f32.mrf.mxu1  ;;  %v4727_v12 = vld [vmem:[#allocation10 + $0x38] sm:$0xff]   ;;  %4510 = vmatprep.subr.bf16.mxu1 %v4726_v10 }
 0x439   :  { %v2996_v17 = vrot.slane %v5200_v14, 4  ;;  %v3042_v18 = vmul.f32 %v5200_v14, %v5200_v14  ;;  %v5205_v2 = vadd.f32 %v2815_v16, %v2774_v15  ;;  %v4728_v15 = vld [vmem:[#allocation10 + $0xb8] sm:$0xff]   ;;  %4489 = vmatpush3.bf16.msra.mxu0 %v4727_v12  ;;  %v4729_v16 = vld [vmem:[#allocation10 + $0x70] sm:$0xff]  }
 0x43a   :  { %v2776_v1 = vpop.f32.mrf.mxu0  ;;  %v2817_v21 = vpop.f32.mrf.mxu1  ;;  %4511 = vmatpush3.bf16.msra.mxu1 %v4728_v15  ;;  %4490 = vmatprep.subr.bf16.mxu0 %v4729_v16 }
 0x43b   :  { %v2997_v59 = vadd.f32 %v2996_v17, %v5200_v14  ;;  %v3060_v22 = vrot.slane %v3042_v18, 4  ;;  %v3002_v23 = vrot.slane %v5205_v2, 4  ;;  %v3043_v24 = vmul.f32 %v5205_v2, %v5205_v2  ;;  %v4730_v17 = vld [vmem:[#allocation10 + $0xf0] sm:$0xff]   ;;  %v4734_v21 = vld [vmem:[#allocation10 + $0xe8] sm:$0xff]  }
 0x43c   :  { %v2777_v25 = vpop.f32.mrf.mxu0  ;;  %v2818_v29 = vpop.f32.mrf.mxu1  ;;  %v4732_v1 = vld [vmem:[#allocation10 + $0xb0] sm:$0xff]   ;;  %4512 = vmatprep.subr.bf16.mxu1 %v4730_v17 }
 0x43d   :  { %v2998_v30 = vrot.slane %v2997_v59, 2  ;;  %v3061_v35 = vadd.f32 %v3060_v22, %v3042_v18  ;;  %v3003_v32 = vadd.f32 %v3002_v23, %v5205_v2  ;;  %v3066_v36 = vrot.slane %v3043_v24, 4  ;;  %v4731_v18 = vld [vmem:[#allocation10 + $0x30] sm:$0xff]   ;;  %v4736_v22 = vld [vmem:[#allocation10 + $0xa8] sm:$0xff]   ;;  %v4737_v23 = vld [vmem:[#allocation10 + $0x60] sm:$0xff]  }
 0x43e   :  { %4491 = vmatpush3.bf16.msra.mxu0 %v4731_v18  ;;  %4513 = vmatpush3.bf16.msra.mxu1 %v4732_v1  ;;  %v4739_v25 = vld [vmem:[#allocation10 + $0x20] sm:$0xff]  }
 0x43f   :  { %v2999_v33 = vadd.f32 %v2998_v30, %v2997_v59  ;;  %v3062_v37 = vrot.slane %v3061_v35, 2  ;;  %v3004_v27 = vrot.slane %v3003_v32, 2  ;;  %v3067_v38 = vadd.f32 %v3066_v36, %v3043_v24  ;;  %v4735_v59 = vld [vmem:[#allocation10 + $0x28] sm:$0xff]   ;;  %4492 = vmatprep.subr.bf16.mxu0 %v4733_v9  ;;  %4514 = vmatprep.subr.bf16.mxu1 %v4734_v21  ;;  %v4738_v24 = vld [vmem:[#allocation10 + $0xe0] sm:$0xff]   ;;  %v4741_v30 = vld [vmem:[#allocation10 + $0x58] sm:$0xff]  }
 0x440   :  { %v4740_v29 = vld [vmem:[#allocation10 + $0xa0] sm:$0xff]   ;;  %v4744_v36 = vld [vmem:[#allocation10 + $0x98] sm:$0xff]  }
 0x441   :  { %v3000_v39 = vrot.slane %v2999_v33, 1  ;;  %v3063_v40 = vadd.f32 %v3062_v37, %v3061_v35  ;;  %v3005_v41 = vadd.f32 %v3004_v27, %v3003_v32  ;;  %v3068_v28 = vrot.slane %v3067_v38, 2  ;;  %v4742_v35 = vld [vmem:[#allocation10 + $0xd8] sm:$0xff]   ;;  %v4746_v37 = vld [vmem:[#allocation10 + $0xd0] sm:$0xff]  }
 0x442   :  { %4493 = vmatpush3.bf16.msra.mxu0 %v4735_v59  ;;  %4515 = vmatpush3.bf16.msra.mxu1 %v4736_v22  ;;  %v4743_v32 = vld [vmem:[#allocation10 + $0x18] sm:$0xff]   ;;  %v4747_v27 = vld [vmem:[#allocation10 + $0x10] sm:$0xff]  }
 0x443   :  { %v3001_v44 = vadd.f32 %v3000_v39, %v2999_v33  ;;  %v3064_v31 = vrot.slane %v3063_v40, 1  ;;  %v3006_v34 = vrot.slane %v3005_v41, 1  ;;  %v3069_v45 = vadd.f32 %v3068_v28, %v3067_v38  ;;  %4494 = vmatprep.subr.bf16.mxu0 %v4737_v23  ;;  %4516 = vmatprep.subr.bf16.mxu1 %v4738_v24  ;;  %v4745_v33 = vld [vmem:[#allocation10 + $0x50] sm:$0xff]  }
 0x444   :  { %v4748_v38 = vld [vmem:[#allocation10 + $0x90] sm:$0xff]  }
 0x445   :  { %v5212_v46 = vmul.f32 0.125, %v3001_v44  ;;  %v3065_v47 = vadd.f32 %v3064_v31, %v3063_v40  ;;  %v3007_v48 = vadd.f32 %v3006_v34, %v3005_v41  ;;  %v3070_v51 = vrot.slane %v3069_v45, 1  ;;  %v4749_v40 = vld [vmem:[#allocation10 + $0x48] sm:$0xff]  }
 0x446   :  { %4495 = vmatpush3.bf16.msra.mxu0 %v4739_v25  ;;  %4517 = vmatpush3.bf16.msra.mxu1 %v4740_v29  ;;  %v4750_v41 = vld [vmem:[#allocation10 + $0xc8] sm:$0xff]  }
 0x447   :  { %v3098_v52 = vmul.f32 0.125, %v3065_v47  ;;  %v3106_v53 = vmul.f32 %v5212_v46, %v5212_v46  ;;  %v5216_v55 = vmul.f32 0.125, %v3007_v48  ;;  %v3071_v57 = vadd.f32 %v3070_v51, %v3069_v45  ;;  %4496 = vmatprep.subr.bf16.mxu0 %v4741_v30  ;;  %4518 = vmatprep.subr.bf16.mxu1 %v4742_v35  ;;  %v4751_v45 = vld [vmem:[#allocation10 + $0x8] sm:$0xff]  }
 0x448   :  { %v4752_v47 = vld [vmem:[#allocation10 + $0x88] sm:$0xff]  }
 0x449   :  { %v3114_v49 = vsub.f32 %v3098_v52, %v3106_v53  ;;  %v3099_v50 = vmul.f32 0.125, %v3071_v57  ;;  %v3107_v58 = vmul.f32 %v5216_v55, %v5216_v55  ;;  %v4753_v52 = vld [vmem:[#allocation10 + $0x40] sm:$0xff]  }
 0x44a   :  { %4497 = vmatpush3.bf16.msra.mxu0 %v4743_v32  ;;  %4519 = vmatpush3.bf16.msra.mxu1 %v4744_v36  ;;  %v4754_v53 = vld [vmem:[#allocation10 + $0xc0] sm:$0xff]  }
 0x44b   :  { %v3122_v62 = vadd.f32 0.8, %v3114_v49  ;;  %v3115_v0 = vsub.f32 %v3099_v50, %v3107_v58  ;;  %4498 = vmatprep.subr.bf16.mxu0 %v4745_v33  ;;  %4520 = vmatprep.subr.bf16.mxu1 %v4746_v37  ;;  %v4755_v58 = vld [vmem:[#allocation10] sm:$0xff]  }
 0x44d   :  { %v3123_v3 = vadd.f32 0.8, %v3115_v0  ;;  %4805 = vrsqrt.f32 %v3122_v62  ;;  %v4756_v62 = vld [vmem:[#allocation10 + $0x80] sm:$0xff]   ;;  %v4757_v0 = vld [vmem:[#allocation10 + $0x178] sm:$0xff]  }
 0x44e   :  { %4499 = vmatpush3.bf16.msra.mxu0 %v4747_v27  ;;  %4521 = vmatpush3.bf16.msra.mxu1 %v4748_v38 }
 0x44f   :  { %4807 = vrsqrt.f32 %v3123_v3  ;;  %4500 = vmatprep.subr.bf16.mxu0 %v4749_v40  ;;  %4522 = vmatprep.subr.bf16.mxu1 %v4750_v41  ;;  %v4758_v3 = vld [vmem:[#allocation10 + $0x1f8] sm:$0xff]  }
 0x452   :  { %4501 = vmatpush3.bf16.msra.mxu0 %v4751_v45  ;;  %4523 = vmatpush3.bf16.msra.mxu1 %v4752_v47 }
 0x453   :  { %4502 = vmatprep.subr.bf16.mxu0 %v4753_v52  ;;  %4524 = vmatprep.subr.bf16.mxu1 %v4754_v53 }
 0x456   :  { %4503 = vmatpush3.bf16.msra.mxu0 %v4755_v58  ;;  %4525 = vmatpush3.bf16.msra.mxu1 %v4756_v62 }
 0x457   :  { %4532 = vmatprep.subr.bf16.mxu0 %v4757_v0  ;;  %4554 = vmatprep.subr.bf16.mxu1 %v4758_v3 }
 0x45a   :  { %v4806_v4 = vpop.eup %4805 }
 0x45c   :  { %v4808_v5 = vpop.eup %4807 }
 0x45d   :  { %v3145_v6 = vcombine.low %v4806_v4, %v4808_v5 }
 0x45f   :  { %v5224_v8 = vrot.slane %v3145_v6, %v5068_v13 }
 0x461   :  { %v3176_v54 = vcombine.low %v5221_v7, %v5224_v8 }
 0x476   :  { %v2854_v39 = vpop.f32.mrf.mxu0 }
 0x477   :  { %v2895_v28 = vpop.f32.mrf.mxu1 }
 0x478   :  { %v5228_v44 = vadd.f32 %v2895_v28, %v2854_v39  ;;  %v2856_v31 = vpop.f32.mrf.mxu0 }
 0x479   :  { %v2897_v34 = vpop.f32.mrf.mxu1 }
 0x47a   :  { %v5230_v48 = vadd.f32 %v2897_v34, %v2856_v31  ;;  %v2858_v51 = vpop.f32.mrf.mxu0  ;;  %v3008_v6 = vrot.slane %v5228_v44, 4  ;;  %v3044_v61 = vmul.f32 %v5228_v44, %v5228_v44 }
 0x47b   :  { %v2899_v57 = vpop.f32.mrf.mxu1 }
 0x47c   :  { %v2859_v49 = vpop.f32.mrf.mxu0  ;;  %v3014_v4 = vrot.slane %v5230_v48, 4  ;;  %v3045_v5 = vmul.f32 %v5230_v48, %v5230_v48  ;;  %v3009_v15 = vadd.f32 %v3008_v6, %v5228_v44  ;;  %v3072_v16 = vrot.slane %v3044_v61, 4 }
 0x47d   :  { %v2900_v50 = vpop.f32.mrf.mxu1 }
 0x47e   :  { %v3015_v10 = vadd.f32 %v3014_v4, %v5230_v48  ;;  %v3078_v12 = vrot.slane %v3045_v5, 4  ;;  %v3010_v1 = vrot.slane %v3009_v15, 2  ;;  %v3073_v9 = vadd.f32 %v3072_v16, %v3044_v61 }
 0x480   :  { %v3016_v17 = vrot.slane %v3015_v10, 2  ;;  %v3079_v18 = vadd.f32 %v3078_v12, %v3045_v5  ;;  %v3011_v22 = vadd.f32 %v3010_v1, %v3009_v15  ;;  %v3074_v23 = vrot.slane %v3073_v9, 2 }
 0x482   :  { %v3017_v21 = vadd.f32 %v3016_v17, %v3015_v10  ;;  %v3080_v59 = vrot.slane %v3079_v18, 2  ;;  %v3012_v29 = vrot.slane %v3011_v22, 1  ;;  %v3075_v30 = vadd.f32 %v3074_v23, %v3073_v9 }
 0x484   :  { %v3018_v24 = vrot.slane %v3017_v21, 1  ;;  %v3081_v25 = vadd.f32 %v3080_v59, %v3079_v18  ;;  %v3013_v38 = vadd.f32 %v3012_v29, %v3011_v22  ;;  %v3076_v39 = vrot.slane %v3075_v30, 1 }
 0x486   :  { %v3019_v32 = vadd.f32 %v3018_v24, %v3017_v21  ;;  %v3082_v36 = vrot.slane %v3081_v25, 1  ;;  %v5253_v58 = vmul.f32 0.125, %v3013_v38  ;;  %v3077_v62 = vadd.f32 %v3076_v39, %v3075_v30 }
 0x488   :  { %v5247_v45 = vmul.f32 0.125, %v3019_v32  ;;  %v3083_v47 = vadd.f32 %v3082_v36, %v3081_v25  ;;  %v3100_v18 = vmul.f32 0.125, %v3077_v62  ;;  %v3108_v1 = vmul.f32 %v5253_v58, %v5253_v58 }
 0x48a   :  { %v3101_v61 = vmul.f32 0.125, %v3083_v47  ;;  %v3109_v10 = vmul.f32 %v5247_v45, %v5247_v45 }
 0x48c   :  { %v3117_v23 = vsub.f32 %v3101_v61, %v3109_v10 }
 0x48e   :  { %v3125_v38 = vadd.f32 0.8, %v3117_v23 }
 0x490   :  { %4809 = vrsqrt.f32 %v3125_v38 }
 0x4b6   :  { %v2936_v35 = vpop.f32.mrf.mxu0 }
 0x4b7   :  { %v2977_v33 = vpop.f32.mrf.mxu1 }
 0x4b8   :  { %v5240_v37 = vadd.f32 %v2977_v33, %v2936_v35  ;;  %v2938_v27 = vpop.f32.mrf.mxu0  ;;  %v3116_v35 = vsub.f32 %v3100_v18, %v3108_v1  ;;  %v3218_v1 = vsub.s32 5, %v5065_v11 }
 0x4b9   :  { %v2979_v40 = vpop.f32.mrf.mxu1 }
 0x4ba   :  { %v3020_v41 = vrot.slane %v5240_v37, 4  ;;  %v3046_v28 = vmul.f32 %v5240_v37, %v5240_v37  ;;  %v5245_v31 = vadd.f32 %v2979_v40, %v2938_v27  ;;  %v2940_v34 = vpop.f32.mrf.mxu0 }
 0x4bb   :  { %v2981_v51 = vpop.f32.mrf.mxu1  ;;  %v3124_v34 = vadd.f32 0.8, %v3116_v35 }
 0x4bc   :  { %v3021_v52 = vadd.f32 %v3020_v41, %v5240_v37  ;;  %v3084_v53 = vrot.slane %v3046_v28, 4  ;;  %v3026_v57 = vrot.slane %v5245_v31, 4  ;;  %v3047_v49 = vmul.f32 %v5245_v31, %v5245_v31  ;;  %v2941_v50 = vpop.f32.mrf.mxu0 }
 0x4bd   :  { %v2982_v0 = vpop.f32.mrf.mxu1  ;;  %4811 = vrsqrt.f32 %v3124_v34  ;;  %v4810_v50 = vpop.eup %4809 }
 0x4be   :  { %v3022_v3 = vrot.slane %v3021_v52, 2  ;;  %v3085_v4 = vadd.f32 %v3084_v53, %v3046_v28  ;;  %v3027_v5 = vadd.f32 %v3026_v57, %v5245_v31  ;;  %v3090_v6 = vrot.slane %v3047_v49, 4 }
 0x4c0   :  { %v3023_v12 = vadd.f32 %v3022_v3, %v3021_v52  ;;  %v3086_v15 = vrot.slane %v3085_v4, 2  ;;  %v3028_v16 = vrot.slane %v3027_v5, 2  ;;  %v3091_v17 = vadd.f32 %v3090_v6, %v3047_v49 }
 0x4c2   :  { %v3024_v9 = vrot.slane %v3023_v12, 1  ;;  %v3087_v21 = vadd.f32 %v3086_v15, %v3085_v4  ;;  %v3029_v59 = vadd.f32 %v3028_v16, %v3027_v5  ;;  %v3092_v22 = vrot.slane %v3091_v17, 2  ;;  %v123_v16 = vld [vmem:[#allocation12 + $0xd] sm:$0xff] }
 0x4c4   :  { %v3025_v24 = vadd.f32 %v3024_v9, %v3023_v12  ;;  %v3088_v25 = vrot.slane %v3087_v21, 1  ;;  %v3030_v29 = vrot.slane %v3029_v59, 1  ;;  %v3093_v30 = vadd.f32 %v3092_v22, %v3091_v17 }
 0x4c5   :  { %v3184_v12 = vrot.slane %v3176_v54, %v5068_v13  ;;  %v3214_v17 = vsub.s32 4, %v5065_v11  ;;  %v3222_v9 = vsub.s32 6, %v5065_v11 }
 0x4c6   :  { %v3038_v32 = vmul.f32 0.125, %v3025_v24  ;;  %v3089_v36 = vadd.f32 %v3088_v25, %v3087_v21  ;;  %v3031_v33 = vadd.f32 %v3030_v29, %v3029_v59  ;;  %v3094_v27 = vrot.slane %v3093_v30, 1 }
 0x4c7   :  { %v3226_v21 = vsub.s32 7, %v5065_v11 }
 0x4c8   :  { %v3102_v39 = vmul.f32 0.125, %v3089_v36  ;;  %v3110_v40 = vmul.f32 %v3038_v32, %v3038_v32  ;;  %v3039_v41 = vmul.f32 0.125, %v3031_v33  ;;  %v3095_v28 = vadd.f32 %v3094_v27, %v3093_v30 }
 0x4ca   :  { %v3118_v47 = vsub.f32 %v3102_v39, %v3110_v40  ;;  %v3103_v51 = vmul.f32 0.125, %v3095_v28  ;;  %v3111_v52 = vmul.f32 %v3039_v41, %v3039_v41  ;;  %v4812_v62 = vpop.eup %4811 }
 0x4cb   :  { %v3146_v3 = vcombine.low %v4812_v62, %v4810_v50 }
 0x4cc   :  { %v3126_v53 = vadd.f32 0.8, %v3118_v47  ;;  %v3119_v57 = vsub.f32 %v3103_v51, %v3111_v52 }
 0x4cd   :  { %v3168_v6 = vrot.slane %v3146_v3, %v5068_v13 }
 0x4ce   :  { %v3127_v49 = vadd.f32 0.8, %v3119_v57  ;;  %4813 = vrsqrt.f32 %v3126_v53 }
 0x4d0   :  { %4815 = vrsqrt.f32 %v3127_v49 }
 0x4db   :  { %v4814_v0 = vpop.eup %4813 }
 0x4dd   :  { %v4816_v4 = vpop.eup %4815 }
 0x4de   :  { %v3147_v5 = vcombine.low %v4814_v0, %v4816_v4 }
 0x4e0   :  { %v3175_v61 = vrot.slane %v3147_v5, %v5068_v13 }
 0x4e2   :  { %v3177_v10 = vcombine.low %v3168_v6, %v3175_v61 }
 0x4e4   :  { %v3191_v15 = vrot.slane %v3177_v10, %v5068_v13 }
 0x4e6   :  { %v3192_v18 = vcombine.low %v3184_v12, %v3191_v15 }
 0x4e8   :  { %v3194_v59 = vmul.f32 %v3192_v18, %v123_v16 }
 0x4ea   :  { %v3215_v22 = vrot.slane %v3194_v59, %v3214_v17  ;;  %v3219_v23 = vrot.slane %v3194_v59, %v3218_v1  ;;  %v3223_v24 = vrot.slane %v3194_v59, %v3222_v9  ;;  %v3227_v25 = vrot.slane %v3194_v59, %v3226_v21 }
 0x4eb   :  { %v3199_v7 = vrot.slane %v3194_v59, %v5073_v19  ;;  %v3203_v8 = vrot.slane %v3194_v59, %v5076_v20  ;;  %v3207_v54 = vrot.slane %v3194_v59, %v5130_v42  ;;  %v3211_v29 = vrot.slane %v3194_v59, %v5133_v43 }
 0x4ec   :  { %v3240_v30 = vmul.f32 %v3215_v22, %v5253_v58  ;;  %v3241_v35 = vmul.f32 %v3219_v23, %v5247_v45  ;;  %v3242_v36 = vmul.f32 %v3223_v24, %v3038_v32  ;;  %v3243_v33 = vmul.f32 %v3227_v25, %v3039_v41 }
 0x4ed   :  { %v3310_v11 = vmul.f32 %v3227_v25, %v5245_v31  ;;  %v3236_v27 = vmul.f32 %v3199_v7, %v5192_v56  ;;  %v3237_v38 = vmul.f32 %v3203_v8, %v5196_v63  ;;  %v3238_v39 = vmul.f32 %v3207_v54, %v5212_v46  ;;  %v4760_v25 = vld [vmem:[#allocation10 + $0x1b8] sm:$0xff]  }
 0x4ee   :  { %v3254_v40 = vcombine.low %v3240_v30, %v3241_v35  ;;  %v3255_v28 = vcombine.low %v3242_v36, %v3243_v33  ;;  %v3239_v34 = vmul.f32 %v3211_v29, %v5216_v55  ;;  %v3304_v47 = vmul.f32 %v3203_v8, %v5185_v26  ;;  %v4762_v35 = vld [vmem:[#allocation10 + $0x1f0] sm:$0xff]  }
 0x4ef   :  { %v3252_v51 = vcombine.low %v3236_v27, %v3237_v38  ;;  %v3306_v58 = vmul.f32 %v3211_v29, %v5205_v2  ;;  %v3303_v45 = vmul.f32 %v3199_v7, %v5180_v60  ;;  %v3305_v32 = vmul.f32 %v3207_v54, %v5200_v14  ;;  %v124_v60 = vld [vmem:[#allocation12 + $0x15] sm:$0xff] }
 0x4f0   :  { %v3276_v31 = vrot.slane %v3254_v40, %v5068_v13  ;;  %v3283_v56 = vrot.slane %v3255_v28, %v5068_v13  ;;  %v3253_v63 = vcombine.low %v3238_v39, %v3239_v34  ;;  %v3309_v41 = vmul.f32 %v3223_v24, %v5240_v37  ;;  %v4759_v24 = vld [vmem:[#allocation10 + $0x138] sm:$0xff]   ;;  %v4761_v29 = vld [vmem:[#allocation10 + $0x170] sm:$0xff]   ;;  %v4765_v39 = vld [vmem:[#allocation10 + $0x168] sm:$0xff]  }
 0x4f1   :  { %v3262_v46 = vrot.slane %v3252_v51, %v5068_v13  ;;  %v3308_v49 = vmul.f32 %v3219_v23, %v5230_v48  ;;  %v3307_v50 = vmul.f32 %v3215_v22, %v5228_v44  ;;  %v4764_v27 = vld [vmem:[#allocation10 + $0x1b0] sm:$0xff]   ;;  %v4766_v40 = vld [vmem:[#allocation10 + $0x1e8] sm:$0xff]   ;;  %v4770_v51 = vld [vmem:[#allocation10 + $0x1e0] sm:$0xff]  }
 0x4f2   :  { %v3285_v52 = vcombine.low %v3276_v31, %v3283_v56  ;;  %v3269_v55 = vrot.slane %v3253_v63, %v5068_v13  ;;  %v4767_v28 = vld [vmem:[#allocation10 + $0x128] sm:$0xff]   ;;  %v4774_v31 = vld [vmem:[#allocation10 + $0x1d8] sm:$0xff]  }
 0x4f3   :  { %v4768_v34 = vld [vmem:[#allocation10 + $0x1a8] sm:$0xff]   ;;  %v4775_v56 = vld [vmem:[#allocation10 + $0x118] sm:$0xff]  }
 0x4f4   :  { %v3299_v26 = vrot.slane %v3285_v52, %v5068_v13  ;;  %v3284_v53 = vcombine.low %v3262_v46, %v3269_v55  ;;  %v4776_v63 = vld [vmem:[#allocation10 + $0x198] sm:$0xff]   ;;  %v4777_v46 = vld [vmem:[#allocation10 + $0x150] sm:$0xff]  }
 0x4f5   :  { %v4779_v52 = vld [vmem:[#allocation10 + $0x110] sm:$0xff]  }
 0x4f6   :  { %v3292_v2 = vrot.slane %v3284_v53, %v5068_v13  ;;  %v4780_v55 = vld [vmem:[#allocation10 + $0x190] sm:$0xff]   ;;  %v4782_v53 = vld [vmem:[#allocation10 + $0x1c8] sm:$0xff]  }
 0x4f8   :  { %v3300_v57 = vcombine.low %v3292_v2, %v3299_v26  ;;  %v4781_v26 = vld [vmem:[#allocation10 + $0x148] sm:$0xff]  }
 0x4f9   :  { %v4783_v2 = vld [vmem:[#allocation10 + $0x108] sm:$0xff]  }
 0x4fa   :  { %v3302_v14 = vsub.f32 %v124_v60, %v3300_v57  ;;  %v4784_v60 = vld [vmem:[#allocation10 + $0x188] sm:$0xff]   ;;  %v4785_v57 = vld [vmem:[#allocation10 + $0x140] sm:$0xff]  }
 0x4fc   :  { %v3319_v62 = vrot.slane %v3302_v14, %v5076_v20  ;;  %v3327_v0 = vrot.slane %v3302_v14, %v5133_v43  ;;  %v3315_v37 = vrot.slane %v3302_v14, %v5073_v19  ;;  %v3323_v3 = vrot.slane %v3302_v14, %v5130_v42 }
 0x4fd   :  { %v3335_v4 = vrot.slane %v3302_v14, %v3218_v1  ;;  %v3343_v5 = vrot.slane %v3302_v14, %v3226_v21  ;;  %v3331_v6 = vrot.slane %v3302_v14, %v3214_v17  ;;  %v3339_v61 = vrot.slane %v3302_v14, %v3222_v9  ;;  %v4786_v14 = vld [vmem:[#allocation10 + $0x1c0] sm:$0xff]  }
 0x4fe   :  { %v3353_v13 = vadd.f32 %v3319_v62, %v3304_v47  ;;  %v3355_v10 = vadd.f32 %v3327_v0, %v3306_v58  ;;  %v3352_v12 = vadd.f32 %v3315_v37, %v3303_v45  ;;  %v3354_v15 = vadd.f32 %v3323_v3, %v3305_v32  ;;  %v4769_v47 = vld [vmem:[#allocation10 + $0x160] sm:$0xff]   ;;  %v4773_v32 = vld [vmem:[#allocation10 + $0x158] sm:$0xff]  }
 0x4ff   :  { %v3357_v16 = vadd.f32 %v3335_v4, %v3308_v49  ;;  %v3359_v48 = vadd.f32 %v3343_v5, %v3310_v11  ;;  %v5299_v18 = vadd.f32 %v3331_v6, %v3307_v50  ;;  %v5301_v44 = vadd.f32 %v3339_v61, %v3309_v41  ;;  %v4763_v11 = vld [vmem:[#allocation10 + $0x130] sm:$0xff]   ;;  %v4771_v58 = vld [vmem:[#allocation10 + $0x120] sm:$0xff]  }
 0x500   :  { %vm3361_vm9 = vcmp.gt.f32.partialorder %v3353_v13, 0.0  ;;  %v3369_v20 = vmul.f32 0.2, %v3353_v13  ;;  %vm3363_vm10 = vcmp.gt.f32.partialorder %v3355_v10, 0.0  ;;  %v3371_v19 = vmul.f32 0.2, %v3355_v10 }
 0x501   :  { %vm3360_vm11 = vcmp.gt.f32.partialorder %v3352_v12, 0.0  ;;  %v3368_v42 = vmul.f32 0.2, %v3352_v12  ;;  %vm3362_vm12 = vcmp.gt.f32.partialorder %v3354_v15, 0.0  ;;  %v3370_v43 = vmul.f32 0.2, %v3354_v15 }
 0x502   :  { %v3377_v17 = vsel %vm3361_vm9, %v3353_v13, %v3369_v20  ;;  %v3379_v1 = vsel %vm3363_vm10, %v3355_v10, %v3371_v19  ;;  %vm3365_vm13 = vcmp.gt.f32.partialorder %v3357_v16, 0.0  ;;  %v3373_v9 = vmul.f32 0.2, %v3357_v16  ;;  %v4772_v45 = vld [vmem:[#allocation10 + $0x1a0] sm:$0xff]   ;;  %v4778_v41 = vld [vmem:[#allocation10 + $0x1d0] sm:$0xff]  }
 0x503   :  { %v3385_v21 = vpack.c.bf16 %v3377_v17, %v3377_v17  ;;  %v3387_v59 = vpack.c.bf16 %v3379_v1, %v3379_v1  ;;  %v3376_v22 = vsel %vm3360_vm11, %v3352_v12, %v3368_v42  ;;  %v3378_v23 = vsel %vm3362_vm12, %v3354_v15, %v3370_v43  ;;  %v4787_v62 = vld [vmem:[#allocation10 + $0x100] sm:$0xff]   ;;  %v4420_v19 = vld [vmem:[#allocation12 + $0x1d] ss:$0 sm:$0xff] }
 0x504   :  { %v3384_v7 = vpack.c.bf16 %v3376_v22, %v3376_v22  ;;  %v3386_v8 = vpack.c.bf16 %v3378_v23, %v3378_v23  ;;  %v3381_v54 = vsel %vm3365_vm13, %v3357_v16, %v3373_v9  ;;  %vm3367_vm14 = vcmp.gt.f32.partialorder %v3359_v48, 0.0  ;;  %v4788_v0 = vld [vmem:[#allocation10 + $0x180] sm:$0xff]  }
 0x505   :  { %3942 = vmatprep.mubr.bf16.mxu0 %v3385_v21  ;;  %3982 = vmatprep.mubr.bf16.mxu1 %v3387_v59  ;;  %v3375_v30 = vmul.f32 0.2, %v3359_v48  ;;  %v3389_v36 = vpack.c.bf16 %v3381_v54, %v3381_v54  ;;  %v3372_v49 = vmul.f32 0.2, %v5299_v18  ;;  %v3374_v50 = vmul.f32 0.2, %v5301_v44 }
 0x506   :  { %3943 = vmatmul.mubr.bf16.vlgmr.msra.gmra.mxu0 %v3384_v7  ;;  %3983 = vmatmul.mubr.bf16.vlgmr.msra.gmra.mxu1 %v3386_v8  ;;  %vm3364_vm15 = vcmp.gt.f32.partialorder %v5299_v18, 0.0  ;;  %vm3366_vm0 = vcmp.gt.f32.partialorder %v5301_v44, 0.0 }
 0x507   :  { %4533 = vmatpush3.bf16.msra.mxu0 %v4759_v24  ;;  %4555 = vmatpush3.bf16.msra.mxu1 %v4760_v25  ;;  %v3383_v33 = vsel %vm3367_vm14, %v3359_v48, %v3375_v30  ;;  %v3380_v37 = vsel %vm3364_vm15, %v5299_v18, %v3372_v49  ;;  %v3382_v3 = vsel %vm3366_vm0, %v5301_v44, %v3374_v50 }
 0x508   :  { %4022 = vmatprep.mubr.bf16.mxu0 %v3389_v36  ;;  %v3391_v38 = vpack.c.bf16 %v3383_v33, %v3383_v33  ;;  %4534 = vmatprep.subr.bf16.mxu0 %v4761_v29  ;;  %v3388_v4 = vpack.c.bf16 %v3380_v37, %v3380_v37  ;;  %v3390_v5 = vpack.c.bf16 %v3382_v3, %v3382_v3 }
 0x509   :  { %4556 = vmatprep.subr.bf16.mxu1 %v4762_v35 }
 0x50a   :  { %4062 = vmatprep.mubr.bf16.mxu1 %v3391_v38 }
 0x50b   :  { %4535 = vmatpush3.bf16.msra.mxu0 %v4763_v11  ;;  %4557 = vmatpush3.bf16.msra.mxu1 %v4764_v27 }
 0x50c   :  { %4536 = vmatprep.subr.bf16.mxu0 %v4765_v39  ;;  %4558 = vmatprep.subr.bf16.mxu1 %v4766_v40 }
 0x50f   :  { %4537 = vmatpush3.bf16.msra.mxu0 %v4767_v28  ;;  %4559 = vmatpush3.bf16.msra.mxu1 %v4768_v34 }
 0x510   :  { %4538 = vmatprep.subr.bf16.mxu0 %v4769_v47  ;;  %4560 = vmatprep.subr.bf16.mxu1 %v4770_v51 }
 0x513   :  { %4539 = vmatpush3.bf16.msra.mxu0 %v4771_v58  ;;  %4561 = vmatpush3.bf16.msra.mxu1 %v4772_v45 }
 0x514   :  { %4540 = vmatprep.subr.bf16.mxu0 %v4773_v32  ;;  %4562 = vmatprep.subr.bf16.mxu1 %v4774_v31 }
 0x517   :  { %4541 = vmatpush3.bf16.msra.mxu0 %v4775_v56  ;;  %4563 = vmatpush3.bf16.msra.mxu1 %v4776_v63 }
 0x518   :  { %4542 = vmatprep.subr.bf16.mxu0 %v4777_v46  ;;  %4564 = vmatprep.subr.bf16.mxu1 %v4778_v41 }
 0x51b   :  { %4543 = vmatpush3.bf16.msra.mxu0 %v4779_v52  ;;  %4565 = vmatpush3.bf16.msra.mxu1 %v4780_v55 }
 0x51c   :  { %4544 = vmatprep.subr.bf16.mxu0 %v4781_v26  ;;  %4566 = vmatprep.subr.bf16.mxu1 %v4782_v53 }
 0x51f   :  { %4545 = vmatpush3.bf16.msra.mxu0 %v4783_v2  ;;  %4567 = vmatpush3.bf16.msra.mxu1 %v4784_v60 }
 0x520   :  { %4546 = vmatprep.subr.bf16.mxu0 %v4785_v57  ;;  %4568 = vmatprep.subr.bf16.mxu1 %v4786_v14 }
 0x523   :  { %4547 = vmatpush3.bf16.msra.mxu0 %v4787_v62  ;;  %4569 = vmatpush3.bf16.msra.mxu1 %v4788_v0 }
 0x526   :  { %4023 = vmatmul.mubr.bf16.vlgmr.msra.gmra.mxu0 %v3388_v4  ;;  %4063 = vmatmul.mubr.bf16.vlgmr.msra.gmra.mxu1 %v3390_v5 }
 0x5c6   :  { %v4504_v6 = vpop.f32.mrf.mxu0  ;;  %v4526_v61 = vpop.f32.mrf.mxu1 }
 0x5c8   :  { %v4505_v13 = vpop.f32.mrf.mxu0  ;;  %v4527_v10 = vpop.f32.mrf.mxu1 }
 0x5c9   :  { %v4506_v20 = vadd.f32 %v4505_v13, %v4504_v6  ;;  %v4528_v44 = vadd.f32 %v4527_v10, %v4526_v61 }
 0x5ca   :  { %v4507_v12 = vpop.f32.mrf.mxu0  ;;  %v4529_v15 = vpop.f32.mrf.mxu1 }
 0x5cb   :  { %v3945_v42 = vadd.f32 %v4506_v20, %v4420_v19 }
 0x5cc   :  { %v4508_v16 = vpop.f32.mrf.mxu0  ;;  %v4530_v48 = vpop.f32.mrf.mxu1 }
 0x5cd   :  { %v3985_v9 = vadd.f32 %v4528_v44, %v3945_v42 }
 0x5e6   :  { %v4548_v18 = vpop.f32.mrf.mxu0  ;;  %v4570_v43 = vpop.f32.mrf.mxu1 }
 0x5e8   :  { %v4549_v17 = vpop.f32.mrf.mxu0  ;;  %v4571_v1 = vpop.f32.mrf.mxu1 }
 0x5e9   :  { %v4550_v21 = vadd.f32 %v4549_v17, %v4548_v18  ;;  %v4572_v24 = vadd.f32 %v4571_v1, %v4570_v43 }
 0x5ea   :  { %v4551_v59 = vpop.f32.mrf.mxu0  ;;  %v4573_v22 = vpop.f32.mrf.mxu1 }
 0x5eb   :  { %v4025_v23 = vadd.f32 %v4550_v21, %v3985_v9 }
 0x5ec   :  { %v4552_v25 = vpop.f32.mrf.mxu0  ;;  %v4574_v7 = vpop.f32.mrf.mxu1 }
 0x5ed   :  { %v4065_v8 = vadd.f32 %v4572_v24, %v4025_v23 }
 0x5ef   :  { %4817 = vtanh.f32 %v4065_v8 }
 0x5fc   :  { %v4818_v54 = vpop.eup %4817 }
 0x5fd   :  { %4071 = vst [vmem:[%s5319_s7] sm:$0xff] %v4818_v54 }
 0x5fe   :  { %4076 = vsyncpa [#allocation3], 1 }
 0x5ff   :  { %4077 = vsyncpa [#allocation5], 1 }
 0x600   :  { %4078 = vsyncpa [#allocation8], 1 }
 0x601   :  { %4079 = vsyncpa [#allocation11], 1 }

</bundles_post_ra>
